<compile_context>
chip_gen: v5e
topology: v5e:2x2
jax: 0.10.0
libtpu: 0.0.40
codegen_flags: <defaults>
</compile_context>

<pallas_src>
import jax
import jax.numpy as jnp
from jax.experimental import pallas as pl
from jax.experimental.pallas import tpu as pltpu

IN_FEATURES = 784
K_PAD = 896          # 7 * 128: contraction dim padded to a lane multiple
HIDDEN = 512
OUT_FEATURES = 1
OUT_PAD = 128        # lane-dense output slab; column 0 holds the real logit
TILE_N = 512         # batch rows per grid step


def _round_up(a, b):
    return (a + b - 1) // b * b


def _disc_kernel(x_ref, w1_ref, b1_ref, w2_ref, b2_ref, o_ref):
    # Layer 1: (tile, 896) @ (896, 512) on the MXU, bf16 operands, f32 accumulate.
    h = jnp.dot(x_ref[...], w1_ref[...], preferred_element_type=jnp.float32)
    h = h + b1_ref[...]                       # (tile, 512) + (1, 512) broadcast
    h = jnp.maximum(h, 0.1 * h)               # LeakyReLU(negative_slope=0.1)

    # Layer 2: padded to 128 output lanes -> lane-dense MXU result and store.
    z = jnp.dot(h.astype(jnp.bfloat16), w2_ref[...],
                preferred_element_type=jnp.float32)
    z = z + b2_ref[...]                       # (tile, 128) + (1, 128) broadcast
    o_ref[...] = jax.nn.sigmoid(z).astype(o_ref.dtype)


def discriminator_forward(x, w1, b1, w2, b2):
    """x: (N,1,28,28) or (N,784). w1:(784,512) b1:(512,) w2:(512,1) b2:(1,).
    Returns (N, 1) float32, matching the torch discriminator forward."""
    x2d = x.reshape(-1, IN_FEATURES).astype(jnp.float32)   # == torch x.view(-1, 784)
    n = x2d.shape[0]

    tile = min(TILE_N, _round_up(n, 8))       # small batches -> single small tile
    n_pad = _round_up(n, tile)

    # Zero-pad: batch -> tile multiple, K 784 -> 896; cast MXU operands to bf16.
    x_p = jnp.zeros((n_pad, K_PAD), jnp.bfloat16)
    x_p = x_p.at[:n, :IN_FEATURES].set(x2d.astype(jnp.bfloat16))
    w1_p = jnp.zeros((K_PAD, HIDDEN), jnp.bfloat16)
    w1_p = w1_p.at[:IN_FEATURES, :].set(w1.astype(jnp.bfloat16))
    b1_p = b1.reshape(1, HIDDEN).astype(jnp.float32)
    w2_p = jnp.zeros((HIDDEN, OUT_PAD), jnp.bfloat16)
    w2_p = w2_p.at[:, :OUT_FEATURES].set(w2.reshape(HIDDEN, OUT_FEATURES).astype(jnp.bfloat16))
    b2_p = jnp.zeros((1, OUT_PAD), jnp.float32)
    b2_p = b2_p.at[:, :OUT_FEATURES].set(b2.reshape(1, OUT_FEATURES).astype(jnp.float32))

    grid = (n_pad // tile,)

    out = pl.pallas_call(
        _disc_kernel,
        out_shape=jax.ShapeDtypeStruct((n_pad, OUT_PAD), jnp.float32),
        grid=grid,
        in_specs=[
            pl.BlockSpec((tile, K_PAD), lambda i: (i, 0)),      # x tile (pipelined)
            pl.BlockSpec((K_PAD, HIDDEN), lambda i: (0, 0)),    # W1, VMEM-resident
            pl.BlockSpec((1, HIDDEN), lambda i: (0, 0)),        # b1
            pl.BlockSpec((HIDDEN, OUT_PAD), lambda i: (0, 0)),  # W2 (lane-padded)
            pl.BlockSpec((1, OUT_PAD), lambda i: (0, 0)),       # b2 (lane-padded)
        ],
        out_specs=pl.BlockSpec((tile, OUT_PAD), lambda i: (i, 0)),
        compiler_params=pltpu.CompilerParams(
            dimension_semantics=("parallel",),   # v7x: split batch tiles across 2 TCs
            vmem_limit_bytes=16 << 20,           # ~4 MiB working set @ tile=512 + headroom
        ),
    )(x_p, w1_p, b1_p, w2_p, b2_p)

    return out[:n, :OUT_FEATURES]


def init_params(key):
    """Deterministic init mimicking nn.Linear's U(-1/sqrt(fan_in), 1/sqrt(fan_in)).
    Weights are stored transposed vs torch.nn.Linear: (in_features, out_features)."""
    k1, k2, k3, k4 = jax.random.split(key, 4)
    bound1 = 1.0 / jnp.sqrt(IN_FEATURES)
    bound2 = 1.0 / jnp.sqrt(HIDDEN)
    w1 = jax.random.uniform(k1, (IN_FEATURES, HIDDEN), jnp.float32, -bound1, bound1)
    b1 = jax.random.uniform(k2, (HIDDEN,), jnp.float32, -bound1, bound1)
    w2 = jax.random.uniform(k3, (HIDDEN, OUT_FEATURES), jnp.float32, -bound2, bound2)
    b2 = jax.random.uniform(k4, (OUT_FEATURES,), jnp.float32, -bound2, bound2)
    return w1, b1, w2, b2


def _reference(x, w1, b1, w2, b2):
    x2d = x.reshape(-1, IN_FEATURES).astype(jnp.float32)
    h = x2d @ w1 + b1.reshape(1, HIDDEN)
    h = jnp.where(h > 0, h, 0.1 * h)
    return jax.nn.sigmoid(h @ w2 + b2.reshape(1, OUT_FEATURES))


if __name__ == "__main__":
    key = jax.random.PRNGKey(0)
    pkey, xkey1, xkey2 = jax.random.split(key, 3)
    w1, b1, w2, b2 = init_params(pkey)

    # Small MNIST-like batch: (N=8, C=1, H=28, W=28)
    x = jax.random.normal(xkey1, (8, 1, 28, 28), jnp.float32)
    out = jax.block_until_ready(discriminator_forward(x, w1, b1, w2, b2))
    ref = _reference(x, w1, b1, w2, b2)
    assert out.shape == (8, 1)
    # bf16 MXU operands with f32 accumulation -> compare to f32 ref at loose tol.
    assert jnp.allclose(out, ref, atol=5e-3), float(jnp.max(jnp.abs(out - ref)))

    # Non-multiple-of-tile batch exercises the batch-padding path.
    x2 = jax.random.normal(xkey2, (13, 1, 28, 28), jnp.float32)
    out2 = jax.block_until_ready(discriminator_forward(x2, w1, b1, w2, b2))
    ref2 = _reference(x2, w1, b1, w2, b2)
    assert out2.shape == (13, 1)
    assert jnp.allclose(out2, ref2, atol=5e-3), float(jnp.max(jnp.abs(out2 - ref2)))

    print("KERNEL_OK")
</pallas_src>

<mosaic_0001>
module attributes {stable_mosaic.version = 11 : i64} {
  func.func @_disc_kernel(%arg0: i32, %arg1: memref<8x896xbf16, #tpu.memory_space<vmem>>, %arg2: memref<896x512xbf16, #tpu.memory_space<vmem>>, %arg3: memref<1x512xf32, #tpu.memory_space<vmem>>, %arg4: memref<512x128xbf16, #tpu.memory_space<vmem>>, %arg5: memref<1x128xf32, #tpu.memory_space<vmem>>, %arg6: memref<8x128xf32, #tpu.memory_space<vmem>>) attributes {dimension_semantics = [#tpu.dimension_semantics<parallel>], iteration_bounds = array<i64: 1>, scalar_prefetch = 0 : i64, scratch_operands = 0 : i64, tpu.core_type = #tpu.core_type<tc>, window_params = [{transform_indices = @transform_0, window_bounds = array<i64: 8, 896>}, {pipeline_mode = #tpu.pipeline_mode<synchronous>, transform_indices = @transform_1, window_bounds = array<i64: 896, 512>}, {pipeline_mode = #tpu.pipeline_mode<synchronous>, transform_indices = @transform_2, window_bounds = array<i64: 1, 512>}, {pipeline_mode = #tpu.pipeline_mode<synchronous>, transform_indices = @transform_3, window_bounds = array<i64: 512, 128>}, {pipeline_mode = #tpu.pipeline_mode<synchronous>, transform_indices = @transform_4, window_bounds = array<i64: 1, 128>}, {transform_indices = @transform_5, window_bounds = array<i64: 8, 128>}]} {
    %c0 = arith.constant 0 : index
    %c0_0 = arith.constant 0 : index
    %0 = vector.load %arg1[%c0, %c0_0] : memref<8x896xbf16, #tpu.memory_space<vmem>>, vector<8x896xbf16>
    %c0_1 = arith.constant 0 : index
    %c0_2 = arith.constant 0 : index
    %1 = vector.load %arg2[%c0_1, %c0_2] : memref<896x512xbf16, #tpu.memory_space<vmem>>, vector<896x512xbf16>
    %cst = arith.constant dense<0.000000e+00> : vector<8x512xf32>
    %2 = tpu.matmul %0, %1, %cst {dimension_numbers = #tpu.dot_dimension_numbers<[1], [0], [0], [1], [0, 0, 1, 1], [], []>} : vector<8x896xbf16>, vector<896x512xbf16>, vector<8x512xf32> -> vector<8x512xf32>
    %c0_3 = arith.constant 0 : index
    %c0_4 = arith.constant 0 : index
    %3 = vector.load %arg3[%c0_3, %c0_4] : memref<1x512xf32, #tpu.memory_space<vmem>>, vector<1x512xf32>
    %4 = vector.broadcast %3 : vector<1x512xf32> to vector<8x512xf32>
    %5 = arith.addf %2, %4 : vector<8x512xf32>
    %cst_5 = arith.constant 1.000000e-01 : f32
    %6 = vector.broadcast %cst_5 : f32 to vector<8x512xf32>
    %7 = arith.mulf %6, %5 : vector<8x512xf32>
    %8 = arith.maximumf %5, %7 : vector<8x512xf32>
    %9 = arith.truncf %8 : vector<8x512xf32> to vector<8x512xbf16>
    %c0_6 = arith.constant 0 : index
    %c0_7 = arith.constant 0 : index
    %10 = vector.load %arg4[%c0_6, %c0_7] : memref<512x128xbf16, #tpu.memory_space<vmem>>, vector<512x128xbf16>
    %cst_8 = arith.constant dense<0.000000e+00> : vector<8x128xf32>
    %11 = tpu.matmul %9, %10, %cst_8 {dimension_numbers = #tpu.dot_dimension_numbers<[1], [0], [0], [1], [0, 0, 1, 1], [], []>} : vector<8x512xbf16>, vector<512x128xbf16>, vector<8x128xf32> -> vector<8x128xf32>
    %c0_9 = arith.constant 0 : index
    %c0_10 = arith.constant 0 : index
    %12 = vector.load %arg5[%c0_9, %c0_10] : memref<1x128xf32, #tpu.memory_space<vmem>>, vector<1x128xf32>
    %13 = vector.broadcast %12 : vector<1x128xf32> to vector<8x128xf32>
    %14 = arith.addf %11, %13 : vector<8x128xf32>
    %15 = arith.negf %14 : vector<8x128xf32>
    %16 = math.exp %15 : vector<8x128xf32>
    %cst_11 = arith.constant 1.000000e+00 : f32
    %17 = vector.broadcast %cst_11 : f32 to vector<8x128xf32>
    %18 = arith.addf %17, %16 : vector<8x128xf32>
    %19 = arith.divf %17, %18 : vector<8x128xf32>
    %c0_12 = arith.constant 0 : index
    %c0_13 = arith.constant 0 : index
    %20 = vector.load %arg6[%c0_12, %c0_13] : memref<8x128xf32, #tpu.memory_space<vmem>>, vector<8x128xf32>
    tpu.vector_store %arg6[%c0_12, %c0_13], %19 {strides = array<i32>} : memref<8x128xf32, #tpu.memory_space<vmem>>, vector<8x128xf32>,
    return
  }
  func.func @transform_0(%arg0: i32) -> (i32, i32) {
    %c0_i32 = arith.constant 0 : i32
    %c0_i32_0 = arith.constant 0 : i32
    return %arg0, %c0_i32 : i32, i32
  }
  func.func @transform_1(%arg0: i32) -> (i32, i32) {
    %c0_i32 = arith.constant 0 : i32
    %c0_i32_0 = arith.constant 0 : i32
    %c0_i32_1 = arith.constant 0 : i32
    return %c0_i32, %c0_i32_0 : i32, i32
  }
  func.func @transform_2(%arg0: i32) -> (i32, i32) {
    %c0_i32 = arith.constant 0 : i32
    %c0_i32_0 = arith.constant 0 : i32
    %c0_i32_1 = arith.constant 0 : i32
    return %c0_i32, %c0_i32_0 : i32, i32
  }
  func.func @transform_3(%arg0: i32) -> (i32, i32) {
    %c0_i32 = arith.constant 0 : i32
    %c0_i32_0 = arith.constant 0 : i32
    %c0_i32_1 = arith.constant 0 : i32
    return %c0_i32, %c0_i32_0 : i32, i32
  }
  func.func @transform_4(%arg0: i32) -> (i32, i32) {
    %c0_i32 = arith.constant 0 : i32
    %c0_i32_0 = arith.constant 0 : i32
    %c0_i32_1 = arith.constant 0 : i32
    return %c0_i32, %c0_i32_0 : i32, i32
  }
  func.func @transform_5(%arg0: i32) -> (i32, i32) {
    %c0_i32 = arith.constant 0 : i32
    %c0_i32_0 = arith.constant 0 : i32
    return %arg0, %c0_i32 : i32, i32
  }
}

</mosaic_0001>

<bundles_post_ra>
// kernel: tpu_custom_call.1
= control target key start
LH: loop header
LB: loop body
LE: loop exit
PB: predicated region body
PF: predicated region fallthrough
CT: control target
= control target key end

     0   :  { %10 = vsyncpa [#allocation3], 0  ;;  %s3742_s0 = inlined_call_operand.hbm [shape: bf16[8,896], index: 0, kind: input, shape index: {}]   ;;  %s3743_s1 = inlined_call_operand.hbm [shape: bf16[896,512], index: 1, kind: input, shape index: {}]   ;;  %s3744_s2 = inlined_call_operand.hbm [shape: f32[1,512], index: 2, kind: input, shape index: {}]   ;;  %s3745_s3 = inlined_call_operand.hbm [shape: bf16[512,128], index: 3, kind: input, shape index: {}]   ;;  %s3746_s4 = inlined_call_operand.vmem [shape: f32[1,128], index: 4, kind: input, shape index: {}]   ;;  %s3747_s5 = inlined_call_operand.hbm [shape: f32[8,128], index: 5, kind: output, shape index: {}]  }
   0x1   :  { %11 = vsyncpa [#allocation6], 0 }
   0x2   :  { %12 = vsyncpa [#allocation9], 0  ;;  %s29_s20 = sshll.u32 %s3743_s1, 4  ;;  %s30_s20 = int_to_ptr.hbm [resolvable:$true] %s29_s20 }
   0x3   :  { %13 = vsyncpa [#allocation4], 0  ;;  %s3613_s21 = smov [#allocation5]   ;;  %s19_s25 = sshll.u32 %s3742_s0, 4  ;;  %s20_s25 = int_to_ptr.hbm [resolvable:$true] %s19_s25 }
   0x4   :  { %s31_s22 = sshll.u32 %s3613_s21, 4  ;;  %s3614_s26 = smov 256   ;;  %s32_s22 = int_to_ptr.vmem [resolvable:$true] %s31_s22 }
   0x5   :  { %s3615_s27 = smov 16   ;;  %s3616_s28 = smov [#allocation2]  }
   0x6   :  { %37 = dma.hbm_to_vmem [thread:$0]  %s30_s20, 28672, %s32_s22, [#allocation6], %s3614_s26, %s3614_s26, %s3615_s27  }
   0x7   :  { %s21_s29 = sshll.u32 %s3616_s28, 4  ;;  %s43_s7 = sshll.u32 %s3744_s2, 4  ;;  %s22_s29 = int_to_ptr.vmem [resolvable:$true] %s21_s29  ;;  %s44_s7 = int_to_ptr.hbm [resolvable:$true] %s43_s7 }
   0x8   :  { %24 = dma.hbm_to_vmem [thread:$0]  %s20_s25, 448, %s22_s29, [#allocation3]  }
   0x9   :  { %s53_s9 = sshll.u32 %s3745_s3, 4  ;;  %s3617_s10 = smov [#allocation7]   ;;  %s54_s9 = int_to_ptr.hbm [resolvable:$true] %s53_s9 }
   0xa   :  { %s45_s11 = sshll.u32 %s3617_s10, 4  ;;  %s3618_s0 = smov [#allocation8]   ;;  %s46_s11 = int_to_ptr.vmem [resolvable:$true] %s45_s11 }
   0xb   :  { %48 = dma.hbm_to_vmem [thread:$0]  %s44_s7, 64, %s46_s11, [#allocation6]  }
   0xc   :  { %s55_s12 = sshll.u32 %s3618_s0, 4  ;;  %s3619_s13 = smov 64   ;;  %s56_s12 = int_to_ptr.vmem [resolvable:$true] %s55_s12 }
   0xd   :  { %s3620_s14 = smov 4  }
   0xe   :  { %61 = dma.hbm_to_vmem [thread:$0]  %s54_s9, 4096, %s56_s12, [#allocation9], %s3619_s13, %s3619_s13, %s3620_s14  }
   0xf   :  { %3605 = dma.done.wait [#allocation3], 448  }
  0x10   :  { %3606 = vsyncadd [#allocation3], 4294966848 }
  0x11   :  { %3607 = dma.done.wait [#allocation6], 28736  }
  0x12   :  { %3608 = vsyncadd [#allocation6], 4294938560 }
  0x13   :  { %3609 = dma.done.wait [#allocation9], 4096  }
  0x14   :  { %3610 = vsyncadd [#allocation9], 4294963200  ;;  %v2304_v0 = vld [vmem:[#allocation5 + $0xe0] sm:$0xf]  ;;  %v3245_v1 = vld [vmem:[#allocation5 + $0xec] sm:$0xf0] }
  0x15   :  { %v2432_v2 = vld [vmem:[#allocation5 + $0x1e0] sm:$0xf]  ;;  %v2305_v3 = vor.u32 %v3245_v1, %v2304_v0  ;;  %v3277_v4 = vld [vmem:[#allocation5 + $0x1ec] sm:$0xf0]  ;;  %s2178_s18 = sshll.u32 %s3747_s5, 4  ;;  %s2179_s18 = int_to_ptr.hbm [resolvable:$true] %s2178_s18 }
  0x16   :  { %v2560_v5 = vld [vmem:[#allocation5 + $0x2e0] sm:$0xf]  ;;  %v3309_v6 = vld [vmem:[#allocation5 + $0x2ec] sm:$0xf0]  ;;  %v2433_v7 = vor.u32 %v3277_v4, %v2432_v2 }
  0x17   :  { %v2561_v8 = vor.u32 %v3309_v6, %v2560_v5  ;;  %v2688_v9 = vld [vmem:[#allocation5 + $0x3e0] sm:$0xf]  ;;  %v3341_v10 = vld [vmem:[#allocation5 + $0x3ec] sm:$0xf0]  ;;  %1463 = vmatpush.bf16.msra.mxu0 %v2305_v3 }
  0x18   :  { %v2288_v11 = vld [vmem:[#allocation5 + $0xc0] sm:$0xf]  ;;  %v2689_v12 = vor.u32 %v3341_v10, %v2688_v9  ;;  %v3241_v13 = vld [vmem:[#allocation5 + $0xcc] sm:$0xf0]  ;;  %1476 = vmatpush.bf16.msra.mxu1 %v2433_v7 }
  0x19   :  { %v2416_v14 = vld [vmem:[#allocation5 + $0x1c0] sm:$0xf]  ;;  %v3273_v15 = vld [vmem:[#allocation5 + $0x1cc] sm:$0xf0]  ;;  %1489 = vmatpush.bf16.msra.mxu2 %v2561_v8  ;;  %v2289_v16 = vor.u32 %v3241_v13, %v2288_v11 }
  0x1a   :  { %v2417_v17 = vor.u32 %v3273_v15, %v2416_v14  ;;  %v2544_v18 = vld [vmem:[#allocation5 + $0x2c0] sm:$0xf]  ;;  %v3305_v19 = vld [vmem:[#allocation5 + $0x2cc] sm:$0xf0]  ;;  %1502 = vmatpush.bf16.msra.mxu3 %v2689_v12 }
  0x1b   :  { %v2672_v20 = vld [vmem:[#allocation5 + $0x3c0] sm:$0xf]  ;;  %v2545_v21 = vor.u32 %v3305_v19, %v2544_v18  ;;  %v3337_v22 = vld [vmem:[#allocation5 + $0x3cc] sm:$0xf0]  ;;  %1464 = vmatpush.bf16.msra.mxu0 %v2289_v16 }
  0x1c   :  { %v2272_v23 = vld [vmem:[#allocation5 + $0xa0] sm:$0xf]  ;;  %v3237_v24 = vld [vmem:[#allocation5 + $0xac] sm:$0xf0]  ;;  %v2673_v25 = vor.u32 %v3337_v22, %v2672_v20  ;;  %1477 = vmatpush.bf16.msra.mxu1 %v2417_v17 }
  0x1d   :  { %v2400_v26 = vld [vmem:[#allocation5 + $0x1a0] sm:$0xf]  ;;  %v3269_v27 = vld [vmem:[#allocation5 + $0x1ac] sm:$0xf0]  ;;  %v2273_v29 = vor.u32 %v3237_v24, %v2272_v23  ;;  %1490 = vmatpush.bf16.msra.mxu2 %v2545_v21 }
  0x1e   :  { %v2528_v28 = vld [vmem:[#allocation5 + $0x2a0] sm:$0xf]  ;;  %v3301_v30 = vld [vmem:[#allocation5 + $0x2ac] sm:$0xf0]  ;;  %v2401_v33 = vor.u32 %v3269_v27, %v2400_v26  ;;  %1503 = vmatpush.bf16.msra.mxu3 %v2673_v25 }
  0x1f   :  { %v2656_v31 = vld [vmem:[#allocation5 + $0x3a0] sm:$0xf]  ;;  %v3333_v32 = vld [vmem:[#allocation5 + $0x3ac] sm:$0xf0]  ;;  %v2529_v34 = vor.u32 %v3301_v30, %v2528_v28  ;;  %1465 = vmatpush.bf16.msra.mxu0 %v2273_v29 }
  0x20   :  { %v2256_v35 = vld [vmem:[#allocation5 + $0x80] sm:$0xf]  ;;  %v3233_v36 = vld [vmem:[#allocation5 + $0x8c] sm:$0xf0]  ;;  %v2657_v38 = vor.u32 %v3333_v32, %v2656_v31  ;;  %1478 = vmatpush.bf16.msra.mxu1 %v2401_v33 }
  0x21   :  { %v2384_v37 = vld [vmem:[#allocation5 + $0x180] sm:$0xf]  ;;  %v3265_v39 = vld [vmem:[#allocation5 + $0x18c] sm:$0xf0]  ;;  %v2257_v44 = vor.u32 %v3233_v36, %v2256_v35  ;;  %1491 = vmatpush.bf16.msra.mxu2 %v2529_v34 }
  0x22   :  { %v2512_v40 = vld [vmem:[#allocation5 + $0x280] sm:$0xf]  ;;  %v3297_v41 = vld [vmem:[#allocation5 + $0x28c] sm:$0xf0]  ;;  %v2385_v45 = vor.u32 %v3265_v39, %v2384_v37  ;;  %1504 = vmatpush.bf16.msra.mxu3 %v2657_v38  ;;  %v3243_v37 = vld [vmem:[#allocation5 + $0xe4] sm:$0xf] }
  0x23   :  { %v2640_v42 = vld [vmem:[#allocation5 + $0x380] sm:$0xf]  ;;  %v3329_v43 = vld [vmem:[#allocation5 + $0x38c] sm:$0xf0]  ;;  %v2513_v46 = vor.u32 %v3297_v41, %v2512_v40  ;;  %1466 = vmatpush.bf16.msra.mxu0 %v2257_v44  ;;  %v2306_v38 = vld [vmem:[#allocation5 + $0xf0] sm:$0xf0] }
  0x24   :  { %v2240_v47 = vld [vmem:[#allocation5 + $0x60] sm:$0xf]  ;;  %v3229_v48 = vld [vmem:[#allocation5 + $0x6c] sm:$0xf0]  ;;  %v2641_v50 = vor.u32 %v3329_v43, %v2640_v42  ;;  %1479 = vmatpush.bf16.msra.mxu1 %v2385_v45 }
  0x25   :  { %v2368_v49 = vld [vmem:[#allocation5 + $0x160] sm:$0xf]  ;;  %v3261_v51 = vld [vmem:[#allocation5 + $0x16c] sm:$0xf0]  ;;  %v2241_v56 = vor.u32 %v3229_v48, %v2240_v47  ;;  %1492 = vmatpush.bf16.msra.mxu2 %v2513_v46  ;;  %v2309_v46 = vor.u32 %v3243_v37, %v2306_v38 }
  0x26   :  { %v2496_v52 = vld [vmem:[#allocation5 + $0x260] sm:$0xf]  ;;  %v3293_v53 = vld [vmem:[#allocation5 + $0x26c] sm:$0xf0]  ;;  %v2369_v57 = vor.u32 %v3261_v51, %v2368_v49  ;;  %1505 = vmatpush.bf16.msra.mxu3 %v2641_v50  ;;  %v3239_v50 = vld [vmem:[#allocation5 + $0xc4] sm:$0xf] }
  0x27   :  { %v2624_v54 = vld [vmem:[#allocation5 + $0x360] sm:$0xf]  ;;  %v3325_v55 = vld [vmem:[#allocation5 + $0x36c] sm:$0xf0]  ;;  %v2497_v58 = vor.u32 %v3293_v53, %v2496_v52  ;;  %1467 = vmatpush.bf16.msra.mxu0 %v2241_v56  ;;  %v2290_v51 = vld [vmem:[#allocation5 + $0xd0] sm:$0xf0] }
  0x28   :  { %v2224_v59 = vld [vmem:[#allocation5 + $0x40] sm:$0xf]  ;;  %v3225_v60 = vld [vmem:[#allocation5 + $0x4c] sm:$0xf0]  ;;  %v2625_v62 = vor.u32 %v3325_v55, %v2624_v54  ;;  %1480 = vmatpush.bf16.msra.mxu1 %v2369_v57 }
  0x29   :  { %v2352_v61 = vld [vmem:[#allocation5 + $0x140] sm:$0xf]  ;;  %v3257_v63 = vld [vmem:[#allocation5 + $0x14c] sm:$0xf0]  ;;  %v2225_v4 = vor.u32 %v3225_v60, %v2224_v59  ;;  %1493 = vmatpush.bf16.msra.mxu2 %v2497_v58  ;;  %v2293_v59 = vor.u32 %v3239_v50, %v2290_v51 }
  0x2a   :  { %v2480_v0 = vld [vmem:[#allocation5 + $0x240] sm:$0xf]  ;;  %v3289_v1 = vld [vmem:[#allocation5 + $0x24c] sm:$0xf0]  ;;  %v2353_v5 = vor.u32 %v3257_v63, %v2352_v61  ;;  %1506 = vmatpush.bf16.msra.mxu3 %v2625_v62 }
  0x2b   :  { %v2608_v2 = vld [vmem:[#allocation5 + $0x340] sm:$0xf]  ;;  %v3321_v3 = vld [vmem:[#allocation5 + $0x34c] sm:$0xf0]  ;;  %v2481_v6 = vor.u32 %v3289_v1, %v2480_v0  ;;  %1468 = vmatpush.bf16.msra.mxu0 %v2225_v4  ;;  %v3235_v1 = vld [vmem:[#allocation5 + $0xa4] sm:$0xf] }
  0x2c   :  { %v2208_v7 = vld [vmem:[#allocation5 + $0x20] sm:$0xf]  ;;  %v3221_v8 = vld [vmem:[#allocation5 + $0x2c] sm:$0xf0]  ;;  %v2609_v10 = vor.u32 %v3321_v3, %v2608_v2  ;;  %1481 = vmatpush.bf16.msra.mxu1 %v2353_v5  ;;  %v2274_v2 = vld [vmem:[#allocation5 + $0xb0] sm:$0xf0] }
  0x2d   :  { %v2336_v9 = vld [vmem:[#allocation5 + $0x120] sm:$0xf]  ;;  %v3253_v11 = vld [vmem:[#allocation5 + $0x12c] sm:$0xf0]  ;;  %v2209_v16 = vor.u32 %v3221_v8, %v2208_v7  ;;  %1494 = vmatpush.bf16.msra.mxu2 %v2481_v6  ;;  %v80_v5 = vld [vmem:[#allocation2] sm:$0xff] }
  0x2e   :  { %v2464_v12 = vld [vmem:[#allocation5 + $0x220] sm:$0xf]  ;;  %v3285_v13 = vld [vmem:[#allocation5 + $0x22c] sm:$0xf0]  ;;  %v2337_v19 = vor.u32 %v3253_v11, %v2336_v9  ;;  %1507 = vmatpush.bf16.msra.mxu3 %v2609_v10 }
  0x2f   :  { %v2592_v14 = vld [vmem:[#allocation5 + $0x320] sm:$0xf]  ;;  %v3317_v15 = vld [vmem:[#allocation5 + $0x32c] sm:$0xf0]  ;;  %v2465_v20 = vor.u32 %v3285_v13, %v2464_v12  ;;  %1469 = vmatpush.bf16.msra.mxu0 %v2209_v16  ;;  %v322_v12 = vunpack.c.l.b16 %v80_v5  ;;  %v323_v13 = vunpack.c.h.b16 %v80_v5 }
  0x30   :  { %v2192_v17 = vld [vmem:[#allocation5] sm:$0xf]  ;;  %v3217_v18 = vld [vmem:[#allocation5 + $0xc] sm:$0xf0]  ;;  %v2593_v24 = vor.u32 %v3317_v15, %v2592_v14  ;;  %1482 = vmatpush.bf16.msra.mxu1 %v2337_v19  ;;  %v2277_v14 = vor.u32 %v3235_v1, %v2274_v2  ;;  %v2258_v19 = vld [vmem:[#allocation5 + $0x90] sm:$0xf0] }
  0x31   :  { %v2320_v21 = vld [vmem:[#allocation5 + $0x100] sm:$0xf]  ;;  %v3249_v22 = vld [vmem:[#allocation5 + $0x10c] sm:$0xf0]  ;;  %v2193_v31 = vor.u32 %v3217_v18, %v2192_v17  ;;  %1495 = vmatpush.bf16.msra.mxu2 %v2465_v20  ;;  %v3231_v18 = vld [vmem:[#allocation5 + $0x84] sm:$0xf]  ;;  %v3669_v20 = vpack.c.b16 %v322_v12, %v322_v12 }
  0x32   :  { %v2448_v23 = vld [vmem:[#allocation5 + $0x200] sm:$0xf]  ;;  %v3281_v25 = vld [vmem:[#allocation5 + $0x20c] sm:$0xf0]  ;;  %v2321_v35 = vor.u32 %v3249_v22, %v2320_v21  ;;  %1508 = vmatpush.bf16.msra.mxu3 %v2593_v24  ;;  %v3671_v21 = vpack.c.b16 %v323_v13, %v323_v13  ;;  %v3307_v12 = vld [vmem:[#allocation5 + $0x2e4] sm:$0xf] }
  0x33   :  { %v2576_v26 = vld [vmem:[#allocation5 + $0x300] sm:$0xf]  ;;  %v3313_v27 = vld [vmem:[#allocation5 + $0x30c] sm:$0xf0]  ;;  %v2449_v36 = vor.u32 %v3281_v25, %v2448_v23  ;;  %1470 = vmatpush.bf16.msra.mxu0 %v2193_v31 }
  0x34   :  { %v2816_v28 = vld [vmem:[#allocation5 + $0x4e0] sm:$0xf]  ;;  %v3373_v29 = vld [vmem:[#allocation5 + $0x4ec] sm:$0xf0]  ;;  %v2577_v39 = vor.u32 %v3313_v27, %v2576_v26  ;;  %1483 = vmatpush.bf16.msra.mxu1 %v2321_v35 }
  0x35   :  { %v2944_v30 = vld [vmem:[#allocation5 + $0x5e0] sm:$0xf]  ;;  %v3405_v32 = vld [vmem:[#allocation5 + $0x5ec] sm:$0xf0]  ;;  %v2817_v40 = vor.u32 %v3373_v29, %v2816_v28  ;;  %1496 = vmatpush.bf16.msra.mxu2 %v2449_v36  ;;  %v2261_v28 = vor.u32 %v3231_v18, %v2258_v19 }
  0x36   :  { %v3072_v33 = vld [vmem:[#allocation5 + $0x6e0] sm:$0xf]  ;;  %v3437_v34 = vld [vmem:[#allocation5 + $0x6ec] sm:$0xf0]  ;;  %v2945_v41 = vor.u32 %v3405_v32, %v2944_v30  ;;  %1509 = vmatpush.bf16.msra.mxu3 %v2577_v39  ;;  %1471 = vmatmul.bf16.vlgmr.msra.gmra.mxu0 %v3669_v20  ;;  %v3227_v32 = vld [vmem:[#allocation5 + $0x64] sm:$0xf] }
  0x37   :  { %v3073_v42 = vor.u32 %v3437_v34, %v3072_v33  ;;  %v2800_v43 = vld [vmem:[#allocation5 + $0x4c0] sm:$0xf]  ;;  %v3369_v44 = vld [vmem:[#allocation5 + $0x4cc] sm:$0xf0]  ;;  %1515 = vmatpush.bf16.msrb.mxu0 %v2817_v40  ;;  %v2242_v33 = vld [vmem:[#allocation5 + $0x70] sm:$0xf0]  ;;  %1484 = vmatmul.bf16.vlgmr.msra.gmra.mxu1 %v3671_v21 }
  0x38   :  { %v2928_v45 = vld [vmem:[#allocation5 + $0x5c0] sm:$0xf]  ;;  %v3401_v47 = vld [vmem:[#allocation5 + $0x5cc] sm:$0xf0]  ;;  %v2801_v52 = vor.u32 %v3369_v44, %v2800_v43  ;;  %1528 = vmatpush.bf16.msrb.mxu1 %v2945_v41  ;;  %v2245_v40 = vor.u32 %v3227_v32, %v2242_v33  ;;  %v3223_v44 = vld [vmem:[#allocation5 + $0x44] sm:$0xf] }
  0x39   :  { %v3056_v48 = vld [vmem:[#allocation5 + $0x6c0] sm:$0xf]  ;;  %v3433_v49 = vld [vmem:[#allocation5 + $0x6cc] sm:$0xf0]  ;;  %1541 = vmatpush.bf16.msrb.mxu2 %v3073_v42  ;;  %v2929_v54 = vor.u32 %v3401_v47, %v2928_v45  ;;  %v2226_v45 = vld [vmem:[#allocation5 + $0x50] sm:$0xf0] }
  0x3a   :  { %v2784_v53 = vld [vmem:[#allocation5 + $0x4a0] sm:$0xf]  ;;  %v3057_v55 = vor.u32 %v3433_v49, %v3056_v48  ;;  %v3365_v56 = vld [vmem:[#allocation5 + $0x4ac] sm:$0xf0]  ;;  %1554 = vmatpush.bf16.msrb.mxu3 %v2309_v46  ;;  %v3303_v32 = vld [vmem:[#allocation5 + $0x2c4] sm:$0xf] }
  0x3b   :  { %v2912_v57 = vld [vmem:[#allocation5 + $0x5a0] sm:$0xf]  ;;  %v81_v58 = vld [vmem:[#allocation2 + $0x8] sm:$0xff]  ;;  %1516 = vmatpush.bf16.msrb.mxu0 %v2801_v52  ;;  %v2785_v3 = vor.u32 %v3365_v56, %v2784_v53  ;;  %v2229_v52 = vor.u32 %v3223_v44, %v2226_v45  ;;  %v3219_v56 = vld [vmem:[#allocation5 + $0x24] sm:$0xf] }
  0x3c   :  { %v3397_v60 = vld [vmem:[#allocation5 + $0x5ac] sm:$0xf0]  ;;  %v3040_v61 = vld [vmem:[#allocation5 + $0x6a0] sm:$0xf]  ;;  %v324_v63 = vunpack.c.l.b16 %v81_v58  ;;  %v325_v0 = vunpack.c.h.b16 %v81_v58  ;;  %1529 = vmatpush.bf16.msrb.mxu1 %v2929_v54  ;;  %v3267_v45 = vld [vmem:[#allocation5 + $0x1a4] sm:$0xf] }
  0x3d   :  { %v3429_v62 = vld [vmem:[#allocation5 + $0x6ac] sm:$0xf0]  ;;  %1542 = vmatpush.bf16.msrb.mxu2 %v3057_v55  ;;  %v2913_v7 = vor.u32 %v3397_v60, %v2912_v57  ;;  %v2768_v9 = vld [vmem:[#allocation5 + $0x480] sm:$0xf]  ;;  %v2210_v57 = vld [vmem:[#allocation5 + $0x30] sm:$0xf0] }
  0x3e   :  { %v3664_v4 = vpack.c.b16 %v324_v63, %v324_v63  ;;  %v3666_v6 = vpack.c.b16 %v325_v0, %v325_v0  ;;  %v3041_v8 = vor.u32 %v3429_v62, %v3040_v61  ;;  %v3361_v10 = vld [vmem:[#allocation5 + $0x48c] sm:$0xf0]  ;;  %v2896_v11 = vld [vmem:[#allocation5 + $0x580] sm:$0xf]  ;;  %1555 = vmatpush.bf16.msrb.mxu3 %v2293_v59  ;;  %v2213_v5 = vor.u32 %v3219_v56, %v2210_v57  ;;  %v3263_v57 = vld [vmem:[#allocation5 + $0x184] sm:$0xf] }
  0x3f   :  { %v3393_v15 = vld [vmem:[#allocation5 + $0x58c] sm:$0xf0]  ;;  %v3024_v16 = vld [vmem:[#allocation5 + $0x680] sm:$0xf]  ;;  %1517 = vmatpush.bf16.msrb.mxu0 %v2785_v3  ;;  %v2769_v22 = vor.u32 %v3361_v10, %v2768_v9  ;;  %v83_v3 = vld [vmem:[#allocation2 + $0x18] sm:$0xf] }
  0x40   :  { %v3425_v17 = vld [vmem:[#allocation5 + $0x68c] sm:$0xf0]  ;;  %1497 = vmatmul.bf16.vlgmr.msra.gmra.mxu2 %v3664_v4  ;;  %1510 = vmatmul.bf16.vlgmr.msra.gmra.mxu3 %v3666_v6  ;;  %v2897_v23 = vor.u32 %v3393_v15, %v2896_v11  ;;  %v2752_v25 = vld [vmem:[#allocation5 + $0x460] sm:$0xf]  ;;  %v82_v9 = vld [vmem:[#allocation2 + $0x10] sm:$0xff] }
  0x41   :  { %1530 = vmatpush.bf16.msrb.mxu1 %v2913_v7  ;;  %1543 = vmatpush.bf16.msrb.mxu2 %v3041_v8  ;;  %v3025_v24 = vor.u32 %v3425_v17, %v3024_v16  ;;  %v3357_v26 = vld [vmem:[#allocation5 + $0x46c] sm:$0xf0]  ;;  %v2880_v27 = vld [vmem:[#allocation5 + $0x560] sm:$0xf]  ;;  %v3215_v7 = vld [vmem:[#allocation5 + $0x4] sm:$0xf]  ;;  %v328_v17 = vunpack.c.l.b16 %v83_v3 }
  0x42   :  { %1556 = vmatpush.bf16.msrb.mxu3 %v2277_v14  ;;  %v3389_v29 = vld [vmem:[#allocation5 + $0x56c] sm:$0xf0]  ;;  %v3008_v30 = vld [vmem:[#allocation5 + $0x660] sm:$0xf]  ;;  %v2753_v34 = vor.u32 %v3357_v26, %v2752_v25  ;;  %v2194_v8 = vld [vmem:[#allocation5 + $0x10] sm:$0xf0]  ;;  %v327_v25 = vunpack.c.h.b16 %v82_v9 }
  0x43   :  { %v3421_v31 = vld [vmem:[#allocation5 + $0x66c] sm:$0xf0]  ;;  %1518 = vmatpush.bf16.msrb.mxu0 %v2769_v22  ;;  %v2881_v35 = vor.u32 %v3389_v29, %v2880_v27  ;;  %v2736_v37 = vld [vmem:[#allocation5 + $0x440] sm:$0xf]  ;;  %v3275_v10 = vld [vmem:[#allocation5 + $0x1e4] sm:$0xf]  ;;  %v2197_v26 = vor.u32 %v3215_v7, %v2194_v8 }
  0x44   :  { %v3009_v36 = vor.u32 %v3421_v31, %v3008_v30  ;;  %v3353_v38 = vld [vmem:[#allocation5 + $0x44c] sm:$0xf0]  ;;  %v2864_v39 = vld [vmem:[#allocation5 + $0x540] sm:$0xf]  ;;  %v2434_v11 = vld [vmem:[#allocation5 + $0x1f0] sm:$0xf0] }
  0x45   :  { %1531 = vmatpush.bf16.msrb.mxu1 %v2897_v23  ;;  %1544 = vmatpush.bf16.msrb.mxu2 %v3025_v24  ;;  %v3385_v41 = vld [vmem:[#allocation5 + $0x54c] sm:$0xf0]  ;;  %v2992_v42 = vld [vmem:[#allocation5 + $0x640] sm:$0xf]  ;;  %v2737_v46 = vor.u32 %v3353_v38, %v2736_v37  ;;  %v2562_v14 = vld [vmem:[#allocation5 + $0x2f0] sm:$0xf0]  ;;  %v326_v24 = vunpack.c.l.b16 %v82_v9  ;;  %v2437_v27 = vor.u32 %v3275_v10, %v2434_v11  ;;  %v3676_v37 = vpack.c.b16 %v328_v17, %v328_v17 }
  0x46   :  { %1557 = vmatpush.bf16.msrb.mxu3 %v2261_v28  ;;  %v3417_v43 = vld [vmem:[#allocation5 + $0x64c] sm:$0xf0]  ;;  %v2865_v47 = vor.u32 %v3385_v41, %v2864_v39  ;;  %v2720_v49 = vld [vmem:[#allocation5 + $0x420] sm:$0xf]  ;;  %v3339_v15 = vld [vmem:[#allocation5 + $0x3e4] sm:$0xf]  ;;  %v2565_v28 = vor.u32 %v3307_v12, %v2562_v14  ;;  %v3680_v41 = vpack.c.b16 %v327_v25, %v327_v25 }
  0x47   :  { %1519 = vmatpush.bf16.msrb.mxu0 %v2753_v34  ;;  %v2993_v48 = vor.u32 %v3417_v43, %v2992_v42  ;;  %v3349_v50 = vld [vmem:[#allocation5 + $0x42c] sm:$0xf0]  ;;  %v2848_v51 = vld [vmem:[#allocation5 + $0x520] sm:$0xf]  ;;  %v2690_v16 = vld [vmem:[#allocation5 + $0x3f0] sm:$0xf0] }
  0x48   :  { %v3381_v53 = vld [vmem:[#allocation5 + $0x52c] sm:$0xf0]  ;;  %v2976_v54 = vld [vmem:[#allocation5 + $0x620] sm:$0xf]  ;;  %v2721_v59 = vor.u32 %v3349_v50, %v2720_v49  ;;  %v3371_v22 = vld [vmem:[#allocation5 + $0x4e4] sm:$0xf]  ;;  %v2693_v29 = vor.u32 %v3339_v15, %v2690_v16 }
  0x49   :  { %1532 = vmatpush.bf16.msrb.mxu1 %v2881_v35  ;;  %1545 = vmatpush.bf16.msrb.mxu2 %v3009_v36  ;;  %v3413_v55 = vld [vmem:[#allocation5 + $0x62c] sm:$0xf0]  ;;  %v2704_v58 = vld [vmem:[#allocation5 + $0x400] sm:$0xf]  ;;  %v2849_v63 = vor.u32 %v3381_v53, %v2848_v51  ;;  %v2818_v23 = vld [vmem:[#allocation5 + $0x4f0] sm:$0xf0] }
  0x4a   :  { %1558 = vmatpush.bf16.msrb.mxu3 %v2245_v40  ;;  %v3345_v60 = vld [vmem:[#allocation5 + $0x40c] sm:$0xf0]  ;;  %v2832_v61 = vld [vmem:[#allocation5 + $0x500] sm:$0xf]  ;;  %v2977_v0 = vor.u32 %v3413_v55, %v2976_v54  ;;  %v3271_v30 = vld [vmem:[#allocation5 + $0x1c4] sm:$0xf]  ;;  %v2821_v33 = vor.u32 %v3371_v22, %v2818_v23  ;;  %v3678_v40 = vpack.c.b16 %v326_v24, %v326_v24 }
  0x4b   :  { %1520 = vmatpush.bf16.msrb.mxu0 %v2737_v46  ;;  %v3377_v62 = vld [vmem:[#allocation5 + $0x50c] sm:$0xf0]  ;;  %v2960_v1 = vld [vmem:[#allocation5 + $0x600] sm:$0xf]  ;;  %v2705_v13 = vor.u32 %v3345_v60, %v2704_v58  ;;  %v2418_v31 = vld [vmem:[#allocation5 + $0x1d0] sm:$0xf0] }
  0x4c   :  { %v3409_v2 = vld [vmem:[#allocation5 + $0x60c] sm:$0xf0]  ;;  %v2833_v18 = vor.u32 %v3377_v62, %v2832_v61  ;;  %v2546_v34 = vld [vmem:[#allocation5 + $0x2d0] sm:$0xf0]  ;;  %v3335_v35 = vld [vmem:[#allocation5 + $0x3c4] sm:$0xf]  ;;  %v2421_v42 = vor.u32 %v3271_v30, %v2418_v31 }
  0x4d   :  { %1533 = vmatpush.bf16.msrb.mxu1 %v2865_v47  ;;  %1546 = vmatpush.bf16.msrb.mxu2 %v2993_v48  ;;  %v2961_v19 = vor.u32 %v3409_v2, %v2960_v1  ;;  %v2674_v36 = vld [vmem:[#allocation5 + $0x3d0] sm:$0xf0]  ;;  %v3367_v38 = vld [vmem:[#allocation5 + $0x4c4] sm:$0xf]  ;;  %v2549_v43 = vor.u32 %v3303_v32, %v2546_v34 }
  0x4e   :  { %1559 = vmatpush.bf16.msrb.mxu3 %v2229_v52  ;;  %v2802_v39 = vld [vmem:[#allocation5 + $0x4d0] sm:$0xf0]  ;;  %v2677_v44 = vor.u32 %v3335_v35, %v2674_v36  ;;  %v3299_v47 = vld [vmem:[#allocation5 + $0x2a4] sm:$0xf] }
  0x4f   :  { %1521 = vmatpush.bf16.msrb.mxu0 %v2721_v59  ;;  %v2402_v46 = vld [vmem:[#allocation5 + $0x1b0] sm:$0xf0]  ;;  %v2805_v48 = vor.u32 %v3367_v38, %v2802_v39  ;;  %v3331_v50 = vld [vmem:[#allocation5 + $0x3a4] sm:$0xf] }
  0x50   :  { %v2530_v49 = vld [vmem:[#allocation5 + $0x2b0] sm:$0xf0]  ;;  %v3363_v52 = vld [vmem:[#allocation5 + $0x4a4] sm:$0xf]  ;;  %v2405_v54 = vor.u32 %v3267_v45, %v2402_v46 }
  0x51   :  { %1534 = vmatpush.bf16.msrb.mxu1 %v2849_v63  ;;  %1547 = vmatpush.bf16.msrb.mxu2 %v2977_v0  ;;  %v2658_v51 = vld [vmem:[#allocation5 + $0x3b0] sm:$0xf0]  ;;  %v2533_v55 = vor.u32 %v3299_v47, %v2530_v49  ;;  %v3295_v59 = vld [vmem:[#allocation5 + $0x284] sm:$0xf] }
  0x52   :  { %1560 = vmatpush.bf16.msrb.mxu3 %v2213_v5  ;;  %v2786_v53 = vld [vmem:[#allocation5 + $0x4b0] sm:$0xf0]  ;;  %v2661_v56 = vor.u32 %v3331_v50, %v2658_v51  ;;  %v3327_v62 = vld [vmem:[#allocation5 + $0x384] sm:$0xf] }
  0x53   :  { %1522 = vmatpush.bf16.msrb.mxu0 %v2705_v13  ;;  %v2386_v58 = vld [vmem:[#allocation5 + $0x190] sm:$0xf0]  ;;  %v2789_v60 = vor.u32 %v3363_v52, %v2786_v53  ;;  %v3359_v0 = vld [vmem:[#allocation5 + $0x484] sm:$0xf] }
  0x54   :  { %v2514_v61 = vld [vmem:[#allocation5 + $0x290] sm:$0xf0]  ;;  %v2389_v2 = vor.u32 %v3263_v57, %v2386_v58  ;;  %v3259_v7 = vld [vmem:[#allocation5 + $0x164] sm:$0xf] }
  0x55   :  { %1535 = vmatpush.bf16.msrb.mxu1 %v2833_v18  ;;  %1548 = vmatpush.bf16.msrb.mxu2 %v2961_v19  ;;  %v2642_v63 = vld [vmem:[#allocation5 + $0x390] sm:$0xf0]  ;;  %v2517_v3 = vor.u32 %v3295_v59, %v2514_v61  ;;  %v3291_v9 = vld [vmem:[#allocation5 + $0x264] sm:$0xf] }
  0x56   :  { %1561 = vmatpush.bf16.msrb.mxu3 %v2197_v26  ;;  %1523 = vmatmul.bf16.vlgmr.msrb.gmra.mxu0 %v3678_v40  ;;  %v2770_v1 = vld [vmem:[#allocation5 + $0x490] sm:$0xf0]  ;;  %v2645_v5 = vor.u32 %v3327_v62, %v2642_v63  ;;  %v3323_v12 = vld [vmem:[#allocation5 + $0x364] sm:$0xf]  ;;  %v2312_v62 = vld [vmem:[#allocation5 + $0xe8] sm:$0xf] }
  0x57   :  { %1567 = vmatpush.bf16.msra.mxu0 %v2437_v27  ;;  %v2370_v8 = vld [vmem:[#allocation5 + $0x170] sm:$0xf0]  ;;  %v2773_v10 = vor.u32 %v3359_v0, %v2770_v1  ;;  %v3355_v14 = vld [vmem:[#allocation5 + $0x464] sm:$0xf]  ;;  %v3246_v63 = vld [vmem:[#allocation5 + $0xf4] sm:$0xf0] }
  0x58   :  { %1549 = vmatmul.bf16.vlgmr.msrb.gmra.mxu2 %v3676_v37  ;;  %1536 = vmatmul.bf16.vlgmr.msrb.gmra.mxu1 %v3680_v41  ;;  %v2498_v11 = vld [vmem:[#allocation5 + $0x270] sm:$0xf0]  ;;  %v2373_v16 = vor.u32 %v3259_v7, %v2370_v8  ;;  %v3255_v19 = vld [vmem:[#allocation5 + $0x144] sm:$0xf] }
  0x59   :  { %1580 = vmatpush.bf16.msra.mxu1 %v2565_v28  ;;  %1593 = vmatpush.bf16.msra.mxu2 %v2693_v29  ;;  %v2626_v13 = vld [vmem:[#allocation5 + $0x370] sm:$0xf0]  ;;  %v2501_v17 = vor.u32 %v3291_v9, %v2498_v11  ;;  %v3287_v23 = vld [vmem:[#allocation5 + $0x244] sm:$0xf]  ;;  %v2313_v9 = vor.u32 %v3246_v63, %v2312_v62 }
  0x5a   :  { %1606 = vmatpush.bf16.msra.mxu3 %v2821_v33  ;;  %v2754_v15 = vld [vmem:[#allocation5 + $0x470] sm:$0xf0]  ;;  %v2629_v18 = vor.u32 %v3323_v12, %v2626_v13  ;;  %v3319_v26 = vld [vmem:[#allocation5 + $0x344] sm:$0xf] }
  0x5b   :  { %1568 = vmatpush.bf16.msra.mxu0 %v2421_v42  ;;  %1562 = vmatmul.bf16.vlgmr.msrb.gmra.mxu3 %v3669_v20  ;;  %v2354_v22 = vld [vmem:[#allocation5 + $0x150] sm:$0xf0]  ;;  %v2757_v24 = vor.u32 %v3355_v14, %v2754_v15  ;;  %v3351_v28 = vld [vmem:[#allocation5 + $0x444] sm:$0xf]  ;;  %v2296_v15 = vld [vmem:[#allocation5 + $0xc8] sm:$0xf] }
  0x5c   :  { %v2482_v25 = vld [vmem:[#allocation5 + $0x250] sm:$0xf0]  ;;  %v2357_v30 = vor.u32 %v3255_v19, %v2354_v22  ;;  %v3251_v33 = vld [vmem:[#allocation5 + $0x124] sm:$0xf] }
  0x5d   :  { %1581 = vmatpush.bf16.msra.mxu1 %v2549_v43  ;;  %1594 = vmatpush.bf16.msra.mxu2 %v2677_v44  ;;  %v2610_v27 = vld [vmem:[#allocation5 + $0x350] sm:$0xf0]  ;;  %v2485_v31 = vor.u32 %v3287_v23, %v2482_v25  ;;  %v3283_v35 = vld [vmem:[#allocation5 + $0x224] sm:$0xf] }
  0x5e   :  { %1607 = vmatpush.bf16.msra.mxu3 %v2805_v48  ;;  %v2738_v29 = vld [vmem:[#allocation5 + $0x450] sm:$0xf0]  ;;  %v2613_v32 = vor.u32 %v3319_v26, %v2610_v27  ;;  %v3315_v39 = vld [vmem:[#allocation5 + $0x324] sm:$0xf] }
  0x5f   :  { %1569 = vmatpush.bf16.msra.mxu0 %v2405_v54  ;;  %v2338_v34 = vld [vmem:[#allocation5 + $0x130] sm:$0xf0]  ;;  %v2741_v36 = vor.u32 %v3351_v28, %v2738_v29  ;;  %v3347_v43 = vld [vmem:[#allocation5 + $0x424] sm:$0xf]  ;;  %v2280_v29 = vld [vmem:[#allocation5 + $0xa8] sm:$0xf] }
  0x60   :  { %v2466_v38 = vld [vmem:[#allocation5 + $0x230] sm:$0xf0]  ;;  %v2341_v45 = vor.u32 %v3251_v33, %v2338_v34  ;;  %v3247_v46 = vld [vmem:[#allocation5 + $0x104] sm:$0xf] }
  0x61   :  { %1582 = vmatpush.bf16.msra.mxu1 %v2533_v55  ;;  %1595 = vmatpush.bf16.msra.mxu2 %v2661_v56  ;;  %v2594_v42 = vld [vmem:[#allocation5 + $0x330] sm:$0xf0]  ;;  %v2469_v48 = vor.u32 %v3283_v35, %v2466_v38  ;;  %v3279_v50 = vld [vmem:[#allocation5 + $0x204] sm:$0xf] }
  0x62   :  { %1608 = vmatpush.bf16.msra.mxu3 %v2789_v60  ;;  %v2722_v44 = vld [vmem:[#allocation5 + $0x430] sm:$0xf0]  ;;  %v2597_v49 = vor.u32 %v3315_v39, %v2594_v42  ;;  %v3311_v52 = vld [vmem:[#allocation5 + $0x304] sm:$0xf] }
  0x63   :  { %1570 = vmatpush.bf16.msra.mxu0 %v2389_v2  ;;  %v2322_v47 = vld [vmem:[#allocation5 + $0x110] sm:$0xf0]  ;;  %v2725_v53 = vor.u32 %v3347_v43, %v2722_v44  ;;  %v3343_v55 = vld [vmem:[#allocation5 + $0x404] sm:$0xf]  ;;  %v2440_v2 = vld [vmem:[#allocation5 + $0x1e8] sm:$0xf] }
  0x64   :  { %v2450_v51 = vld [vmem:[#allocation5 + $0x210] sm:$0xf0]  ;;  %v3403_v57 = vld [vmem:[#allocation5 + $0x5e4] sm:$0xf]  ;;  %v2325_v60 = vor.u32 %v3247_v46, %v2322_v47  ;;  %v2264_v44 = vld [vmem:[#allocation5 + $0x88] sm:$0xf] }
  0x65   :  { %1583 = vmatpush.bf16.msra.mxu1 %v2517_v3  ;;  %1596 = vmatpush.bf16.msra.mxu2 %v2645_v5  ;;  %v2578_v54 = vld [vmem:[#allocation5 + $0x310] sm:$0xf0]  ;;  %v3435_v59 = vld [vmem:[#allocation5 + $0x6e4] sm:$0xf]  ;;  %v2453_v0 = vor.u32 %v3279_v50, %v2450_v51  ;;  %v3278_v3 = vld [vmem:[#allocation5 + $0x1f4] sm:$0xf0] }
  0x66   :  { %1609 = vmatpush.bf16.msra.mxu3 %v2773_v10  ;;  %v2706_v56 = vld [vmem:[#allocation5 + $0x410] sm:$0xf0]  ;;  %v2581_v1 = vor.u32 %v3311_v52, %v2578_v54  ;;  %v3399_v10 = vld [vmem:[#allocation5 + $0x5c4] sm:$0xf]  ;;  %v2441_v13 = vor.u32 %v3278_v3, %v2440_v2  ;;  %v2392_v46 = vld [vmem:[#allocation5 + $0x188] sm:$0xf] }
  0x67   :  { %1571 = vmatpush.bf16.msra.mxu0 %v2373_v16  ;;  %v2946_v58 = vld [vmem:[#allocation5 + $0x5f0] sm:$0xf0]  ;;  %v2709_v5 = vor.u32 %v3343_v55, %v2706_v56  ;;  %v3431_v12 = vld [vmem:[#allocation5 + $0x6c4] sm:$0xf]  ;;  %v3242_v16 = vld [vmem:[#allocation5 + $0xd4] sm:$0xf0] }
  0x68   :  { %v3074_v61 = vld [vmem:[#allocation5 + $0x6f0] sm:$0xf0]  ;;  %v2949_v7 = vor.u32 %v3403_v57, %v2946_v58  ;;  %v2297_v23 = vor.u32 %v3242_v16, %v2296_v15  ;;  %v3427_v26 = vld [vmem:[#allocation5 + $0x6a4] sm:$0xf]  ;;  %v3266_v47 = vld [vmem:[#allocation5 + $0x194] sm:$0xf0] }
  0x69   :  { %1584 = vmatpush.bf16.msra.mxu1 %v2501_v17  ;;  %1597 = vmatpush.bf16.msra.mxu2 %v2629_v18  ;;  %v3077_v8 = vor.u32 %v3435_v59, %v3074_v61  ;;  %v2930_v11 = vld [vmem:[#allocation5 + $0x5d0] sm:$0xf0]  ;;  %v2424_v17 = vld [vmem:[#allocation5 + $0x1c8] sm:$0xf]  ;;  %v3274_v18 = vld [vmem:[#allocation5 + $0x1d4] sm:$0xf0]  ;;  %v2393_v54 = vor.u32 %v3266_v47, %v2392_v46 }
  0x6a   :  { %1610 = vmatpush.bf16.msra.mxu3 %v2757_v24  ;;  %v3058_v14 = vld [vmem:[#allocation5 + $0x6d0] sm:$0xf0]  ;;  %v2933_v19 = vor.u32 %v3399_v10, %v2930_v11  ;;  %v3395_v24 = vld [vmem:[#allocation5 + $0x5a4] sm:$0xf]  ;;  %v2425_v27 = vor.u32 %v3274_v18, %v2424_v17  ;;  %v2248_v56 = vld [vmem:[#allocation5 + $0x68] sm:$0xf] }
  0x6b   :  { %1572 = vmatpush.bf16.msra.mxu0 %v2357_v30  ;;  %v3061_v22 = vor.u32 %v3431_v12, %v3058_v14  ;;  %v2914_v25 = vld [vmem:[#allocation5 + $0x5b0] sm:$0xf0]  ;;  %v3238_v30 = vld [vmem:[#allocation5 + $0xb4] sm:$0xf0]  ;;  %v3423_v39 = vld [vmem:[#allocation5 + $0x684] sm:$0xf] }
  0x6c   :  { %v3042_v28 = vld [vmem:[#allocation5 + $0x6b0] sm:$0xf0]  ;;  %v2917_v33 = vor.u32 %v3395_v24, %v2914_v25  ;;  %v2281_v35 = vor.u32 %v3238_v30, %v2280_v29  ;;  %v3387_v51 = vld [vmem:[#allocation5 + $0x564] sm:$0xf]  ;;  %v3230_v57 = vld [vmem:[#allocation5 + $0x74] sm:$0xf0] }
  0x6d   :  { %1585 = vmatpush.bf16.msra.mxu1 %v2485_v31  ;;  %1598 = vmatpush.bf16.msra.mxu2 %v2613_v32  ;;  %v2408_v31 = vld [vmem:[#allocation5 + $0x1a8] sm:$0xf]  ;;  %v3270_v32 = vld [vmem:[#allocation5 + $0x1b4] sm:$0xf0]  ;;  %v3045_v34 = vor.u32 %v3427_v26, %v3042_v28  ;;  %v2898_v38 = vld [vmem:[#allocation5 + $0x590] sm:$0xf0]  ;;  %v2249_v62 = vor.u32 %v3230_v57, %v2248_v56 }
  0x6e   :  { %1611 = vmatpush.bf16.msra.mxu3 %v2741_v36  ;;  %v3391_v36 = vld [vmem:[#allocation5 + $0x584] sm:$0xf]  ;;  %v2409_v42 = vor.u32 %v3270_v32, %v2408_v31  ;;  %v3026_v43 = vld [vmem:[#allocation5 + $0x690] sm:$0xf0]  ;;  %v2376_v58 = vld [vmem:[#allocation5 + $0x168] sm:$0xf] }
  0x6f   :  { %1573 = vmatpush.bf16.msra.mxu0 %v2341_v45  ;;  %v3234_v45 = vld [vmem:[#allocation5 + $0x94] sm:$0xf0]  ;;  %v2882_v52 = vld [vmem:[#allocation5 + $0x570] sm:$0xf0]  ;;  %v3383_v63 = vld [vmem:[#allocation5 + $0x544] sm:$0xf] }
  0x70   :  { %v2265_v50 = vor.u32 %v3234_v45, %v2264_v44  ;;  %v3010_v55 = vld [vmem:[#allocation5 + $0x670] sm:$0xf0]  ;;  %v3262_v59 = vld [vmem:[#allocation5 + $0x174] sm:$0xf0]  ;;  %v3411_v15 = vld [vmem:[#allocation5 + $0x624] sm:$0xf] }
  0x71   :  { %1586 = vmatpush.bf16.msra.mxu1 %v2469_v48  ;;  %1599 = vmatpush.bf16.msra.mxu2 %v2597_v49  ;;  %v2901_v48 = vor.u32 %v3391_v36, %v2898_v38  ;;  %v3029_v49 = vor.u32 %v3423_v39, %v3026_v43  ;;  %v2377_v2 = vor.u32 %v3262_v59, %v2376_v58  ;;  %v2994_v3 = vld [vmem:[#allocation5 + $0x650] sm:$0xf0]  ;;  %v2216_v18 = vld [vmem:[#allocation5 + $0x28] sm:$0xf]  ;;  %v3375_v25 = vld [vmem:[#allocation5 + $0x504] sm:$0xf] }
  0x72   :  { %1612 = vmatpush.bf16.msra.mxu3 %v2725_v53  ;;  %v3419_v53 = vld [vmem:[#allocation5 + $0x664] sm:$0xf]  ;;  %v2850_v14 = vld [vmem:[#allocation5 + $0x530] sm:$0xf0]  ;;  %v2200_v31 = vld [vmem:[#allocation5 + $0x8] sm:$0xf] }
  0x73   :  { %1574 = vmatpush.bf16.msra.mxu0 %v2325_v60  ;;  %v2885_v60 = vor.u32 %v3387_v51, %v2882_v52  ;;  %v3013_v61 = vor.u32 %v3419_v53, %v3010_v55  ;;  %v2978_v17 = vld [vmem:[#allocation5 + $0x630] sm:$0xf0]  ;;  %v3407_v29 = vld [vmem:[#allocation5 + $0x604] sm:$0xf]  ;;  %v2568_v36 = vld [vmem:[#allocation5 + $0x2e8] sm:$0xf] }
  0x74   :  { %v2834_v26 = vld [vmem:[#allocation5 + $0x510] sm:$0xf0]  ;;  %v3310_v38 = vld [vmem:[#allocation5 + $0x2f4] sm:$0xf0]  ;;  %v2696_v39 = vld [vmem:[#allocation5 + $0x3e8] sm:$0xf] }
  0x75   :  { %1587 = vmatpush.bf16.msra.mxu1 %v2453_v0  ;;  %1600 = vmatpush.bf16.msra.mxu2 %v2581_v1  ;;  %v2866_v0 = vld [vmem:[#allocation5 + $0x550] sm:$0xf0]  ;;  %v3415_v1 = vld [vmem:[#allocation5 + $0x644] sm:$0xf]  ;;  %v3342_v43 = vld [vmem:[#allocation5 + $0x3f4] sm:$0xf0]  ;;  %v2569_v51 = vor.u32 %v3310_v38, %v2568_v36 }
  0x76   :  { %1613 = vmatpush.bf16.msra.mxu3 %v2709_v5  ;;  %1575 = vmatmul.bf16.vlgmr.msra.gmra.mxu0 %v3671_v21  ;;  %v2232_v5 = vld [vmem:[#allocation5 + $0x48] sm:$0xf]  ;;  %v2869_v10 = vor.u32 %v3383_v63, %v2866_v0  ;;  %v2997_v11 = vor.u32 %v3415_v1, %v2994_v3  ;;  %v2962_v30 = vld [vmem:[#allocation5 + $0x610] sm:$0xf0]  ;;  %v3374_v45 = vld [vmem:[#allocation5 + $0x4f4] sm:$0xf0]  ;;  %v2697_v52 = vor.u32 %v3342_v43, %v2696_v39 }
  0x77   :  { %1619 = vmatpush.bf16.msrb.mxu0 %v2949_v7  ;;  %v3226_v7 = vld [vmem:[#allocation5 + $0x54] sm:$0xf0]  ;;  %v2824_v44 = vld [vmem:[#allocation5 + $0x4e8] sm:$0xf]  ;;  %v2965_v46 = vor.u32 %v3407_v29, %v2962_v30 }
  0x78   :  { %1601 = vmatmul.bf16.vlgmr.msra.gmra.mxu2 %v3666_v6  ;;  %1588 = vmatmul.bf16.vlgmr.msra.gmra.mxu1 %v3664_v4  ;;  %v2233_v12 = vor.u32 %v3226_v7, %v2232_v5  ;;  %v2825_v53 = vor.u32 %v3374_v45, %v2824_v44  ;;  %v3306_v55 = vld [vmem:[#allocation5 + $0x2d4] sm:$0xf0]  ;;  %v2680_v56 = vld [vmem:[#allocation5 + $0x3c8] sm:$0xf] }
  0x79   :  { %1632 = vmatpush.bf16.msrb.mxu1 %v3077_v8  ;;  %1645 = vmatpush.bf16.msrb.mxu2 %v2313_v9  ;;  %v2360_v8 = vld [vmem:[#allocation5 + $0x148] sm:$0xf]  ;;  %v3258_v9 = vld [vmem:[#allocation5 + $0x154] sm:$0xf0] }
  0x7a   :  { %1658 = vmatpush.bf16.msrb.mxu3 %v2441_v13  ;;  %v3379_v13 = vld [vmem:[#allocation5 + $0x524] sm:$0xf]  ;;  %v2361_v16 = vor.u32 %v3258_v9, %v2360_v8  ;;  %v3338_v58 = vld [vmem:[#allocation5 + $0x3d4] sm:$0xf0]  ;;  %v2808_v59 = vld [vmem:[#allocation5 + $0x4c8] sm:$0xf] }
  0x7b   :  { %1614 = vmatmul.bf16.vlgmr.msra.gmra.mxu3 %v3678_v40  ;;  %1620 = vmatpush.bf16.msrb.mxu0 %v2933_v19  ;;  %v3222_v19 = vld [vmem:[#allocation5 + $0x34] sm:$0xf0]  ;;  %v2853_v24 = vor.u32 %v3379_v13, %v2850_v14  ;;  %v2681_v0 = vor.u32 %v3338_v58, %v2680_v56  ;;  %v2664_v5 = vld [vmem:[#allocation5 + $0x3a8] sm:$0xf] }
  0x7c   :  { %v2217_v28 = vor.u32 %v3222_v19, %v2216_v18  ;;  %v3302_v3 = vld [vmem:[#allocation5 + $0x2b4] sm:$0xf0]  ;;  %v2792_v9 = vld [vmem:[#allocation5 + $0x4a8] sm:$0xf] }
  0x7d   :  { %1633 = vmatpush.bf16.msrb.mxu1 %v3061_v22  ;;  %1646 = vmatpush.bf16.msrb.mxu2 %v2297_v23  ;;  %v2344_v22 = vld [vmem:[#allocation5 + $0x128] sm:$0xf]  ;;  %v3254_v23 = vld [vmem:[#allocation5 + $0x134] sm:$0xf0] }
  0x7e   :  { %1659 = vmatpush.bf16.msrb.mxu3 %v2425_v27  ;;  %v2981_v27 = vor.u32 %v3411_v15, %v2978_v17  ;;  %v2345_v32 = vor.u32 %v3254_v23, %v2344_v22  ;;  %v3334_v8 = vld [vmem:[#allocation5 + $0x3b4] sm:$0xf0]  ;;  %v2648_v18 = vld [vmem:[#allocation5 + $0x388] sm:$0xf] }
  0x7f   :  { %1621 = vmatpush.bf16.msrb.mxu0 %v2917_v33  ;;  %v3218_v33 = vld [vmem:[#allocation5 + $0x14] sm:$0xf0]  ;;  %v2665_v14 = vor.u32 %v3334_v8, %v2664_v5  ;;  %v2776_v23 = vld [vmem:[#allocation5 + $0x488] sm:$0xf] }
  0x80   :  { %v2201_v47 = vor.u32 %v3218_v33, %v2200_v31  ;;  %v3298_v17 = vld [vmem:[#allocation5 + $0x294] sm:$0xf0]  ;;  %v2504_v30 = vld [vmem:[#allocation5 + $0x268] sm:$0xf] }
  0x81   :  { %1634 = vmatpush.bf16.msrb.mxu1 %v3045_v34  ;;  %1647 = vmatpush.bf16.msrb.mxu2 %v2281_v35  ;;  %v2328_v34 = vld [vmem:[#allocation5 + $0x108] sm:$0xf]  ;;  %v3250_v35 = vld [vmem:[#allocation5 + $0x114] sm:$0xf0] }
  0x82   :  { %1660 = vmatpush.bf16.msrb.mxu3 %v2409_v42  ;;  %v2837_v42 = vor.u32 %v3375_v25, %v2834_v26  ;;  %v3330_v22 = vld [vmem:[#allocation5 + $0x394] sm:$0xf0]  ;;  %v2904_v25 = vld [vmem:[#allocation5 + $0x588] sm:$0xf] }
  0x83   :  { %1622 = vmatpush.bf16.msrb.mxu0 %v2901_v48  ;;  %v2952_v48 = vld [vmem:[#allocation5 + $0x5e8] sm:$0xf]  ;;  %v3394_v26 = vld [vmem:[#allocation5 + $0x594] sm:$0xf0] }
  0x84   :  { %v3294_v31 = vld [vmem:[#allocation5 + $0x274] sm:$0xf0]  ;;  %v2905_v33 = vor.u32 %v3394_v26, %v2904_v25  ;;  %v2888_v38 = vld [vmem:[#allocation5 + $0x568] sm:$0xf] }
  0x85   :  { %1635 = vmatpush.bf16.msrb.mxu1 %v3029_v49  ;;  %1648 = vmatpush.bf16.msrb.mxu2 %v2265_v50  ;;  %v3406_v49 = vld [vmem:[#allocation5 + $0x5f4] sm:$0xf0]  ;;  %v2329_v50 = vor.u32 %v3250_v35, %v2328_v34  ;;  %v2760_v35 = vld [vmem:[#allocation5 + $0x468] sm:$0xf] }
  0x86   :  { %1661 = vmatpush.bf16.msrb.mxu3 %v2393_v54  ;;  %v2552_v54 = vld [vmem:[#allocation5 + $0x2c8] sm:$0xf]  ;;  %v2953_v57 = vor.u32 %v3406_v49, %v2952_v48  ;;  %v3326_v34 = vld [vmem:[#allocation5 + $0x374] sm:$0xf0] }
  0x87   :  { %1623 = vmatpush.bf16.msrb.mxu0 %v2885_v60  ;;  %v3370_v60 = vld [vmem:[#allocation5 + $0x4d4] sm:$0xf0]  ;;  %v2553_v63 = vor.u32 %v3306_v55, %v2552_v54  ;;  %v2488_v45 = vld [vmem:[#allocation5 + $0x248] sm:$0xf] }
  0x88   :  { %v2809_v1 = vor.u32 %v3370_v60, %v2808_v59  ;;  %v3358_v36 = vld [vmem:[#allocation5 + $0x474] sm:$0xf0]  ;;  %v2600_v59 = vld [vmem:[#allocation5 + $0x328] sm:$0xf] }
  0x89   :  { %1636 = vmatpush.bf16.msrb.mxu1 %v3013_v61  ;;  %1649 = vmatpush.bf16.msrb.mxu2 %v2249_v62  ;;  %v2936_v61 = vld [vmem:[#allocation5 + $0x5c8] sm:$0xf]  ;;  %v3402_v62 = vld [vmem:[#allocation5 + $0x5d4] sm:$0xf0]  ;;  %v2761_v44 = vor.u32 %v3358_v36, %v2760_v35  ;;  %v3240_v35 = vld [vmem:[#allocation5 + $0xcc] sm:$0xf] }
  0x8a   :  { %1662 = vmatpush.bf16.msrb.mxu3 %v2377_v2  ;;  %v2536_v2 = vld [vmem:[#allocation5 + $0x2a8] sm:$0xf]  ;;  %v2937_v7 = vor.u32 %v3402_v62, %v2936_v61  ;;  %v3390_v39 = vld [vmem:[#allocation5 + $0x574] sm:$0xf0] }
  0x8b   :  { %1624 = vmatpush.bf16.msrb.mxu0 %v2869_v10  ;;  %v3366_v10 = vld [vmem:[#allocation5 + $0x4b4] sm:$0xf0]  ;;  %v2537_v13 = vor.u32 %v3302_v3, %v2536_v2  ;;  %v2889_v48 = vor.u32 %v3390_v39, %v2888_v38  ;;  %v2728_v62 = vld [vmem:[#allocation5 + $0x428] sm:$0xf]  ;;  %v2298_v38 = vld [vmem:[#allocation5 + $0xd8] sm:$0xf0] }
  0x8c   :  { %v2793_v15 = vor.u32 %v3366_v10, %v2792_v9  ;;  %v3322_v49 = vld [vmem:[#allocation5 + $0x354] sm:$0xf0]  ;;  %v2456_v3 = vld [vmem:[#allocation5 + $0x208] sm:$0xf]  ;;  %v3272_v39 = vld [vmem:[#allocation5 + $0x1cc] sm:$0xf] }
  0x8d   :  { %1637 = vmatpush.bf16.msrb.mxu1 %v2997_v11  ;;  %1650 = vmatpush.bf16.msrb.mxu2 %v2233_v12  ;;  %v2920_v11 = vld [vmem:[#allocation5 + $0x5a8] sm:$0xf]  ;;  %v3398_v12 = vld [vmem:[#allocation5 + $0x5b4] sm:$0xf0] }
  0x8e   :  { %1663 = vmatpush.bf16.msrb.mxu3 %v2361_v16  ;;  %v2520_v16 = vld [vmem:[#allocation5 + $0x288] sm:$0xf]  ;;  %v2921_v19 = vor.u32 %v3398_v12, %v2920_v11  ;;  %v3286_v58 = vld [vmem:[#allocation5 + $0x234] sm:$0xf0] }
  0x8f   :  { %1625 = vmatpush.bf16.msrb.mxu0 %v2853_v24  ;;  %v3362_v24 = vld [vmem:[#allocation5 + $0x494] sm:$0xf0]  ;;  %v2584_v9 = vld [vmem:[#allocation5 + $0x308] sm:$0xf] }
  0x90   :  { %v2777_v29 = vor.u32 %v3362_v24, %v2776_v23  ;;  %v3318_v61 = vld [vmem:[#allocation5 + $0x334] sm:$0xf0]  ;;  %v2712_v11 = vld [vmem:[#allocation5 + $0x408] sm:$0xf]  ;;  %v3276_v23 = vld [vmem:[#allocation5 + $0x1ec] sm:$0xf] }
  0x91   :  { %1638 = vmatpush.bf16.msrb.mxu1 %v2981_v27  ;;  %1651 = vmatpush.bf16.msrb.mxu2 %v2217_v28  ;;  %v2521_v27 = vor.u32 %v3298_v17, %v2520_v16  ;;  %v2649_v28 = vor.u32 %v3330_v22, %v2648_v18  ;;  %v3282_v5 = vld [vmem:[#allocation5 + $0x214] sm:$0xf0]  ;;  %v3080_v16 = vld [vmem:[#allocation5 + $0x6e8] sm:$0xf]  ;;  %v3244_v18 = vld [vmem:[#allocation5 + $0xec] sm:$0xf] }
  0x92   :  { %1664 = vmatpush.bf16.msrb.mxu3 %v2345_v32  ;;  %v2632_v32 = vld [vmem:[#allocation5 + $0x368] sm:$0xf]  ;;  %v3314_v10 = vld [vmem:[#allocation5 + $0x314] sm:$0xf0]  ;;  %v2314_v22 = vld [vmem:[#allocation5 + $0xf8] sm:$0xf0] }
  0x93   :  { %1626 = vmatpush.bf16.msrb.mxu0 %v2837_v42  ;;  %v2505_v42 = vor.u32 %v3294_v31, %v2504_v30  ;;  %v2633_v43 = vor.u32 %v3326_v34, %v2632_v32  ;;  %v3438_v17 = vld [vmem:[#allocation5 + $0x6f4] sm:$0xf0]  ;;  %v2442_v24 = vld [vmem:[#allocation5 + $0x1f8] sm:$0xf0]  ;;  %v2585_v25 = vor.u32 %v3314_v10, %v2584_v9  ;;  %v2317_v31 = vor.u32 %v3244_v18, %v2314_v22  ;;  %v3016_v10 = vld [vmem:[#allocation5 + $0x668] sm:$0xf] }
  0x94   :  { %v3081_v30 = vor.u32 %v3438_v17, %v3080_v16  ;;  %v2445_v32 = vor.u32 %v3276_v23, %v2442_v24  ;;  %v3434_v34 = vld [vmem:[#allocation5 + $0x6d4] sm:$0xf0]  ;;  %v2378_v16 = vld [vmem:[#allocation5 + $0x178] sm:$0xf0]  ;;  %v3292_v17 = vld [vmem:[#allocation5 + $0x26c] sm:$0xf] }
  0x95   :  { %1639 = vmatpush.bf16.msrb.mxu1 %v2965_v46  ;;  %1652 = vmatpush.bf16.msrb.mxu2 %v2201_v47  ;;  %v3290_v46 = vld [vmem:[#allocation5 + $0x254] sm:$0xf0]  ;;  %v2616_v47 = vld [vmem:[#allocation5 + $0x348] sm:$0xf]  ;;  %v2506_v18 = vld [vmem:[#allocation5 + $0x278] sm:$0xf0] }
  0x96   :  { %1665 = vmatpush.bf16.msrb.mxu3 %v2329_v50  ;;  %1627 = vmatmul.bf16.vlgmr.msrb.gmra.mxu0 %v3680_v41  ;;  %v2744_v50 = vld [vmem:[#allocation5 + $0x448] sm:$0xf]  ;;  %v2489_v54 = vor.u32 %v3290_v46, %v2488_v45  ;;  %v2617_v55 = vor.u32 %v3322_v49, %v2616_v47  ;;  %v2301_v46 = vor.u32 %v3240_v35, %v2298_v38  ;;  %v3430_v49 = vld [vmem:[#allocation5 + $0x6b4] sm:$0xf0] }
  0x97   :  { %1671 = vmatpush.bf16.msra.mxu0 %v2569_v51  ;;  %v3354_v51 = vld [vmem:[#allocation5 + $0x454] sm:$0xf0]  ;;  %v3000_v24 = vld [vmem:[#allocation5 + $0x648] sm:$0xf] }
  0x98   :  { %1640 = vmatmul.bf16.vlgmr.msrb.gmra.mxu1 %v3676_v37  ;;  %1653 = vmatmul.bf16.vlgmr.msrb.gmra.mxu2 %v3669_v20  ;;  %v2745_v56 = vor.u32 %v3354_v51, %v2744_v50  ;;  %v3236_v50 = vld [vmem:[#allocation5 + $0xac] sm:$0xf] }
  0x99   :  { %1684 = vmatpush.bf16.msra.mxu1 %v2697_v52  ;;  %1697 = vmatpush.bf16.msra.mxu2 %v2825_v53  ;;  %v2872_v52 = vld [vmem:[#allocation5 + $0x548] sm:$0xf]  ;;  %v3386_v53 = vld [vmem:[#allocation5 + $0x554] sm:$0xf0] }
  0x9a   :  { %1710 = vmatpush.bf16.msra.mxu3 %v2953_v57  ;;  %v2472_v57 = vld [vmem:[#allocation5 + $0x228] sm:$0xf]  ;;  %v2873_v60 = vor.u32 %v3386_v53, %v2872_v52  ;;  %v2282_v52 = vld [vmem:[#allocation5 + $0xb8] sm:$0xf0]  ;;  %v3268_v53 = vld [vmem:[#allocation5 + $0x1ac] sm:$0xf] }
  0x9b   :  { %1672 = vmatpush.bf16.msra.mxu0 %v2553_v63  ;;  %1666 = vmatmul.bf16.vlgmr.msrb.gmra.mxu3 %v3671_v21  ;;  %v3350_v63 = vld [vmem:[#allocation5 + $0x434] sm:$0xf0]  ;;  %v2473_v2 = vor.u32 %v3286_v58, %v2472_v57  ;;  %v2285_v58 = vor.u32 %v3236_v50, %v2282_v52  ;;  %v3284_v50 = vld [vmem:[#allocation5 + $0x22c] sm:$0xf] }
  0x9c   :  { %v2729_v8 = vor.u32 %v3350_v63, %v2728_v62  ;;  %v3232_v62 = vld [vmem:[#allocation5 + $0x8c] sm:$0xf] }
  0x9d   :  { %1685 = vmatpush.bf16.msra.mxu1 %v2681_v0  ;;  %1698 = vmatpush.bf16.msra.mxu2 %v2809_v1  ;;  %v2856_v0 = vld [vmem:[#allocation5 + $0x528] sm:$0xf]  ;;  %v3382_v1 = vld [vmem:[#allocation5 + $0x534] sm:$0xf0] }
  0x9e   :  { %1711 = vmatpush.bf16.msra.mxu3 %v2937_v7  ;;  %v2601_v7 = vor.u32 %v3318_v61, %v2600_v59  ;;  %v2857_v12 = vor.u32 %v3382_v1, %v2856_v0  ;;  %v3426_v61 = vld [vmem:[#allocation5 + $0x694] sm:$0xf0]  ;;  %v2266_v0 = vld [vmem:[#allocation5 + $0x98] sm:$0xf0]  ;;  %v3264_v1 = vld [vmem:[#allocation5 + $0x18c] sm:$0xf] }
  0x9f   :  { %1673 = vmatpush.bf16.msra.mxu0 %v2537_v13  ;;  %v3346_v13 = vld [vmem:[#allocation5 + $0x414] sm:$0xf0] }
  0xa0   :  { %v2713_v26 = vor.u32 %v3346_v13, %v2712_v11  ;;  %v3422_v11 = vld [vmem:[#allocation5 + $0x674] sm:$0xf0] }
  0xa1   :  { %1686 = vmatpush.bf16.msra.mxu1 %v2665_v14  ;;  %1699 = vmatpush.bf16.msra.mxu2 %v2793_v15  ;;  %v2840_v14 = vld [vmem:[#allocation5 + $0x508] sm:$0xf]  ;;  %v3378_v15 = vld [vmem:[#allocation5 + $0x514] sm:$0xf0] }
  0xa2   :  { %1712 = vmatpush.bf16.msra.mxu3 %v2921_v19  ;;  %v2457_v19 = vor.u32 %v3282_v5, %v2456_v3  ;;  %v3296_v3 = vld [vmem:[#allocation5 + $0x28c] sm:$0xf]  ;;  %v2522_v5 = vld [vmem:[#allocation5 + $0x298] sm:$0xf0] }
  0xa3   :  { %1674 = vmatpush.bf16.msra.mxu0 %v2521_v27  ;;  %v3308_v27 = vld [vmem:[#allocation5 + $0x2ec] sm:$0xf]  ;;  %v2525_v13 = vor.u32 %v3296_v3, %v2522_v5 }
  0xa5   :  { %1687 = vmatpush.bf16.msra.mxu1 %v2649_v28  ;;  %1700 = vmatpush.bf16.msra.mxu2 %v2777_v29  ;;  %v2570_v28 = vld [vmem:[#allocation5 + $0x2f8] sm:$0xf0]  ;;  %v2841_v29 = vor.u32 %v3378_v15, %v2840_v14  ;;  %v3260_v15 = vld [vmem:[#allocation5 + $0x16c] sm:$0xf] }
  0xa6   :  { %1713 = vmatpush.bf16.msra.mxu3 %v2905_v33  ;;  %v3064_v33 = vld [vmem:[#allocation5 + $0x6c8] sm:$0xf]  ;;  %v2573_v36 = vor.u32 %v3308_v27, %v2570_v28  ;;  %v2250_v14 = vld [vmem:[#allocation5 + $0x78] sm:$0xf0]  ;;  %v2381_v23 = vor.u32 %v3260_v15, %v2378_v16  ;;  %v2509_v27 = vor.u32 %v3292_v17, %v2506_v18 }
  0xa7   :  { %1675 = vmatpush.bf16.msra.mxu0 %v2505_v42  ;;  %v2426_v42 = vld [vmem:[#allocation5 + $0x1d8] sm:$0xf0]  ;;  %v3065_v45 = vor.u32 %v3434_v34, %v3064_v33 }
  0xa8   :  { %v2429_v47 = vor.u32 %v3272_v39, %v2426_v42  ;;  %v2234_v28 = vld [vmem:[#allocation5 + $0x58] sm:$0xf0]  ;;  %v2984_v39 = vld [vmem:[#allocation5 + $0x628] sm:$0xf]  ;;  %v3414_v42 = vld [vmem:[#allocation5 + $0x634] sm:$0xf0] }
  0xa9   :  { %1688 = vmatpush.bf16.msra.mxu1 %v2633_v43  ;;  %1701 = vmatpush.bf16.msra.mxu2 %v2761_v44  ;;  %v3304_v43 = vld [vmem:[#allocation5 + $0x2cc] sm:$0xf]  ;;  %v2554_v44 = vld [vmem:[#allocation5 + $0x2d8] sm:$0xf0]  ;;  %v2985_v52 = vor.u32 %v3414_v42, %v2984_v39 }
  0xaa   :  { %1714 = vmatpush.bf16.msra.mxu3 %v2889_v48  ;;  %v3048_v48 = vld [vmem:[#allocation5 + $0x6a8] sm:$0xf]  ;;  %v2557_v51 = vor.u32 %v3304_v43, %v2554_v44  ;;  %v3220_v43 = vld [vmem:[#allocation5 + $0x2c] sm:$0xf]  ;;  %v2666_v39 = vld [vmem:[#allocation5 + $0x3b8] sm:$0xf0] }
  0xab   :  { %1676 = vmatpush.bf16.msra.mxu0 %v2489_v54  ;;  %v2410_v54 = vld [vmem:[#allocation5 + $0x1b8] sm:$0xf0]  ;;  %v3049_v57 = vor.u32 %v3430_v49, %v3048_v48  ;;  %v3364_v42 = vld [vmem:[#allocation5 + $0x4ac] sm:$0xf] }
  0xac   :  { %v2413_v59 = vor.u32 %v3268_v53, %v2410_v54  ;;  %v2346_v48 = vld [vmem:[#allocation5 + $0x138] sm:$0xf0]  ;;  %v2968_v53 = vld [vmem:[#allocation5 + $0x608] sm:$0xf]  ;;  %v3410_v54 = vld [vmem:[#allocation5 + $0x614] sm:$0xf0] }
  0xad   :  { %1689 = vmatpush.bf16.msra.mxu1 %v2617_v55  ;;  %1702 = vmatpush.bf16.msra.mxu2 %v2745_v56  ;;  %v3300_v55 = vld [vmem:[#allocation5 + $0x2ac] sm:$0xf]  ;;  %v2538_v56 = vld [vmem:[#allocation5 + $0x2b8] sm:$0xf0]  ;;  %v2969_v5 = vor.u32 %v3410_v54, %v2968_v53 }
  0xae   :  { %1715 = vmatpush.bf16.msra.mxu3 %v2873_v60  ;;  %v3032_v60 = vld [vmem:[#allocation5 + $0x688] sm:$0xf]  ;;  %v2541_v63 = vor.u32 %v3300_v55, %v2538_v56  ;;  %v3328_v54 = vld [vmem:[#allocation5 + $0x38c] sm:$0xf] }
  0xaf   :  { %1677 = vmatpush.bf16.msra.mxu0 %v2473_v2  ;;  %v2394_v2 = vld [vmem:[#allocation5 + $0x198] sm:$0xf0] }
  0xb0   :  { %v2397_v9 = vor.u32 %v3264_v1, %v2394_v2  ;;  %v2698_v1 = vld [vmem:[#allocation5 + $0x3f8] sm:$0xf0]  ;;  %v3372_v2 = vld [vmem:[#allocation5 + $0x4ec] sm:$0xf] }
  0xb1   :  { %1690 = vmatpush.bf16.msra.mxu1 %v2601_v7  ;;  %1703 = vmatpush.bf16.msra.mxu2 %v2729_v8  ;;  %v3033_v7 = vor.u32 %v3426_v61, %v3032_v60  ;;  %v2269_v8 = vor.u32 %v3232_v62, %v2266_v0  ;;  %v2330_v61 = vld [vmem:[#allocation5 + $0x118] sm:$0xf0]  ;;  %v3280_v62 = vld [vmem:[#allocation5 + $0x20c] sm:$0xf] }
  0xb2   :  { %1716 = vmatpush.bf16.msra.mxu3 %v2857_v12  ;;  %v3228_v12 = vld [vmem:[#allocation5 + $0x6c] sm:$0xf] }
  0xb3   :  { %1678 = vmatpush.bf16.msra.mxu0 %v2457_v19  ;;  %v3017_v19 = vor.u32 %v3422_v11, %v3016_v10  ;;  %v2253_v22 = vor.u32 %v3228_v12, %v2250_v14  ;;  %v3698_v33 = vpop.f32.mrf.mxu0  ;;  %v3340_v0 = vld [vmem:[#allocation5 + $0x3ec] sm:$0xf]  ;;  %v3082_v14 = vld [vmem:[#allocation5 + $0x6f8] sm:$0xf0] }
  0xb4   :  { %v3700_v35 = vpop.f32.mrf.mxu1  ;;  %v2701_v17 = vor.u32 %v3340_v0, %v2698_v1  ;;  %v3324_v1 = vld [vmem:[#allocation5 + $0x36c] sm:$0xf] }
  0xb5   :  { %1691 = vmatpush.bf16.msra.mxu1 %v2585_v25  ;;  %1704 = vmatpush.bf16.msra.mxu2 %v2713_v26  ;;  %v3418_v25 = vld [vmem:[#allocation5 + $0x654] sm:$0xf0]  ;;  %v3224_v26 = vld [vmem:[#allocation5 + $0x4c] sm:$0xf] }
  0xb6   :  { %1717 = vmatpush.bf16.msra.mxu3 %v2841_v29  ;;  %1679 = vmatmul.bf16.vlgmr.msra.gmra.mxu0 %v3664_v4  ;;  %v3256_v29 = vld [vmem:[#allocation5 + $0x14c] sm:$0xf]  ;;  %v3001_v34 = vor.u32 %v3418_v25, %v3000_v24  ;;  %v2682_v24 = vld [vmem:[#allocation5 + $0x3d8] sm:$0xf0] }
  0xb7   :  { %1723 = vmatpush.bf16.msrb.mxu0 %v3081_v30  ;;  %v2362_v30 = vld [vmem:[#allocation5 + $0x158] sm:$0xf0]  ;;  %v3368_v25 = vld [vmem:[#allocation5 + $0x4cc] sm:$0xf] }
  0xb8   :  { %1705 = vmatmul.bf16.vlgmr.msra.gmra.mxu2 %v3678_v40  ;;  %1692 = vmatmul.bf16.vlgmr.msra.gmra.mxu1 %v3666_v6  ;;  %v2365_v38 = vor.u32 %v3256_v29, %v2362_v30  ;;  %v2938_v29 = vld [vmem:[#allocation5 + $0x5d8] sm:$0xf0]  ;;  %v3432_v30 = vld [vmem:[#allocation5 + $0x6cc] sm:$0xf] }
  0xb9   :  { %1736 = vmatpush.bf16.msrb.mxu1 %v2317_v31  ;;  %1749 = vmatpush.bf16.msrb.mxu2 %v2445_v32  ;;  %v3288_v31 = vld [vmem:[#allocation5 + $0x24c] sm:$0xf]  ;;  %v2490_v32 = vld [vmem:[#allocation5 + $0x258] sm:$0xf0] }
  0xba   :  { %1762 = vmatpush.bf16.msrb.mxu3 %v2573_v36  ;;  %v2237_v36 = vor.u32 %v3224_v26, %v2234_v28  ;;  %v3400_v28 = vld [vmem:[#allocation5 + $0x5cc] sm:$0xf] }
  0xbb   :  { %1718 = vmatmul.bf16.vlgmr.msra.gmra.mxu3 %v3680_v41  ;;  %1724 = vmatpush.bf16.msrb.mxu0 %v3065_v45  ;;  %v2493_v45 = vor.u32 %v3288_v31, %v2490_v32  ;;  %v1474_v3 = vpop.f32.mrf.mxu0  ;;  %v3066_v31 = vld [vmem:[#allocation5 + $0x6d8] sm:$0xf0] }
  0xbc   :  { %v1487_v10 = vpop.f32.mrf.mxu1  ;;  %v3356_v3 = vld [vmem:[#allocation5 + $0x46c] sm:$0xf] }
  0xbd   :  { %1737 = vmatpush.bf16.msrb.mxu1 %v2301_v46  ;;  %1750 = vmatpush.bf16.msrb.mxu2 %v2429_v47  ;;  %v2218_v46 = vld [vmem:[#allocation5 + $0x38] sm:$0xf0]  ;;  %v3252_v47 = vld [vmem:[#allocation5 + $0x12c] sm:$0xf] }
  0xbe   :  { %1763 = vmatpush.bf16.msrb.mxu3 %v2557_v51  ;;  %v2474_v51 = vld [vmem:[#allocation5 + $0x238] sm:$0xf0]  ;;  %v2221_v55 = vor.u32 %v3220_v43, %v2218_v46  ;;  %v2349_v56 = vor.u32 %v3252_v47, %v2346_v48  ;;  %v3069_v43 = vor.u32 %v3432_v30, %v3066_v31  ;;  %v3396_v46 = vld [vmem:[#allocation5 + $0x5ac] sm:$0xf] }
  0xbf   :  { %1725 = vmatpush.bf16.msrb.mxu0 %v3049_v57  ;;  %v3216_v57 = vld [vmem:[#allocation5 + $0xc] sm:$0xf]  ;;  %v2477_v60 = vor.u32 %v3284_v50, %v2474_v51  ;;  %v2922_v47 = vld [vmem:[#allocation5 + $0x5b8] sm:$0xf0] }
  0xc0   :  { %v3428_v48 = vld [vmem:[#allocation5 + $0x6ac] sm:$0xf]  ;;  %v3050_v50 = vld [vmem:[#allocation5 + $0x6b8] sm:$0xf0]  ;;  %v2925_v53 = vor.u32 %v3396_v46, %v2922_v47 }
  0xc1   :  { %1738 = vmatpush.bf16.msrb.mxu1 %v2285_v58  ;;  %1751 = vmatpush.bf16.msrb.mxu2 %v2413_v59  ;;  %v2202_v58 = vld [vmem:[#allocation5 + $0x18] sm:$0xf0]  ;;  %v3248_v59 = vld [vmem:[#allocation5 + $0x10c] sm:$0xf] }
  0xc2   :  { %1764 = vmatpush.bf16.msrb.mxu3 %v2541_v63  ;;  %v2458_v63 = vld [vmem:[#allocation5 + $0x218] sm:$0xf0]  ;;  %v2205_v11 = vor.u32 %v3216_v57, %v2202_v58  ;;  %v2333_v12 = vor.u32 %v3248_v59, %v2330_v61  ;;  %v3053_v57 = vor.u32 %v3428_v48, %v3050_v50  ;;  %v3392_v59 = vld [vmem:[#allocation5 + $0x58c] sm:$0xf] }
  0xc3   :  { %1726 = vmatpush.bf16.msrb.mxu0 %v3033_v7  ;;  %v3702_v44 = vpop.f32.mrf.mxu2  ;;  %v3704_v49 = vpop.f32.mrf.mxu3  ;;  %v2826_v7 = vld [vmem:[#allocation5 + $0x4f8] sm:$0xf0]  ;;  %v2461_v16 = vor.u32 %v3280_v62, %v2458_v63  ;;  %v3420_v10 = vld [vmem:[#allocation5 + $0x66c] sm:$0xf] }
  0xc4   :  { %v2778_v58 = vld [vmem:[#allocation5 + $0x498] sm:$0xf0]  ;;  %v3412_v48 = vld [vmem:[#allocation5 + $0x62c] sm:$0xf] }
  0xc5   :  { %1739 = vmatpush.bf16.msrb.mxu1 %v2269_v8  ;;  %1752 = vmatpush.bf16.msrb.mxu2 %v2397_v9  ;;  %v3404_v8 = vld [vmem:[#allocation5 + $0x5ec] sm:$0xf]  ;;  %v2954_v9 = vld [vmem:[#allocation5 + $0x5f8] sm:$0xf0] }
  0xc6   :  { %1765 = vmatpush.bf16.msrb.mxu3 %v2525_v13  ;;  %v3436_v13 = vld [vmem:[#allocation5 + $0x6ec] sm:$0xf]  ;;  %v3034_v61 = vld [vmem:[#allocation5 + $0x698] sm:$0xf0] }
  0xc7   :  { %1727 = vmatpush.bf16.msrb.mxu0 %v3017_v19  ;;  %v2829_v19 = vor.u32 %v3372_v2, %v2826_v7  ;;  %v3085_v26 = vor.u32 %v3436_v13, %v3082_v14  ;;  %v2634_v2 = vld [vmem:[#allocation5 + $0x378] sm:$0xf0] }
  0xc8   :  { %v2762_v7 = vld [vmem:[#allocation5 + $0x478] sm:$0xf0] }
  0xc9   :  { %1740 = vmatpush.bf16.msrb.mxu1 %v2253_v22  ;;  %1753 = vmatpush.bf16.msrb.mxu2 %v2381_v23  ;;  %v2957_v22 = vor.u32 %v3404_v8, %v2954_v9  ;;  %v3336_v23 = vld [vmem:[#allocation5 + $0x3cc] sm:$0xf]  ;;  %v2890_v9 = vld [vmem:[#allocation5 + $0x578] sm:$0xf0]  ;;  %v2765_v13 = vor.u32 %v3356_v3, %v2762_v7 }
  0xca   :  { %1766 = vmatpush.bf16.msrb.mxu3 %v2509_v27  ;;  %v2810_v27 = vld [vmem:[#allocation5 + $0x4d8] sm:$0xf0]  ;;  %v2685_v32 = vor.u32 %v3336_v23, %v2682_v24  ;;  %v3388_v8 = vld [vmem:[#allocation5 + $0x56c] sm:$0xf] }
  0xcb   :  { %1728 = vmatpush.bf16.msrb.mxu0 %v3001_v34  ;;  %v1500_v15 = vpop.f32.mrf.mxu2  ;;  %v1513_v18 = vpop.f32.mrf.mxu3  ;;  %v2813_v34 = vor.u32 %v3368_v25, %v2810_v27  ;;  %v2893_v14 = vor.u32 %v3388_v8, %v2890_v9  ;;  %v3384_v23 = vld [vmem:[#allocation5 + $0x54c] sm:$0xf]  ;;  %v2874_v24 = vld [vmem:[#allocation5 + $0x558] sm:$0xf0] }
  0xcc   :  { %v3320_v15 = vld [vmem:[#allocation5 + $0x34c] sm:$0xf]  ;;  %v2858_v46 = vld [vmem:[#allocation5 + $0x538] sm:$0xf0] }
  0xcd   :  { %1741 = vmatpush.bf16.msrb.mxu1 %v2237_v36  ;;  %1754 = vmatpush.bf16.msrb.mxu2 %v2365_v38  ;;  %v2941_v36 = vor.u32 %v3400_v28, %v2938_v29  ;;  %v3332_v38 = vld [vmem:[#allocation5 + $0x3ac] sm:$0xf]  ;;  %v3718_v28 = vld [vmem:[#allocation7] sm:$0xf]  ;;  %v2986_v50 = vld [vmem:[#allocation5 + $0x638] sm:$0xf0] }
  0xce   :  { %1767 = vmatpush.bf16.msrb.mxu3 %v2493_v45  ;;  %v2794_v45 = vld [vmem:[#allocation5 + $0x4b8] sm:$0xf0]  ;;  %v2669_v51 = vor.u32 %v3332_v38, %v2666_v39  ;;  %v3416_v25 = vld [vmem:[#allocation5 + $0x64c] sm:$0xf]  ;;  %v310_v47 = vperm.slane %v3718_v28, 0 }
  0xcf   :  { %1729 = vmatpush.bf16.msrb.mxu0 %v2985_v52  ;;  %v2797_v52 = vor.u32 %v3364_v42, %v2794_v45  ;;  %v2602_v38 = vld [vmem:[#allocation5 + $0x338] sm:$0xf0]  ;;  %v3348_v39 = vld [vmem:[#allocation5 + $0x42c] sm:$0xf] }
  0xd0   :  { %v3380_v45 = vld [vmem:[#allocation5 + $0x52c] sm:$0xf]  ;;  %v3446_v7 = vld [vmem:[#allocation8 + $0x38] sm:$0xff] }
  0xd1   :  { %1742 = vmatpush.bf16.msrb.mxu1 %v2221_v55  ;;  %1755 = vmatpush.bf16.msrb.mxu2 %v2349_v56  ;;  %v2650_v55 = vld [vmem:[#allocation5 + $0x398] sm:$0xf0]  ;;  %v3360_v56 = vld [vmem:[#allocation5 + $0x48c] sm:$0xf] }
  0xd2   :  { %1768 = vmatpush.bf16.msrb.mxu3 %v2477_v60  ;;  %v3424_v60 = vld [vmem:[#allocation5 + $0x68c] sm:$0xf]  ;;  %v3454_v9 = vld [vmem:[#allocation8 + $0x78] sm:$0xff] }
  0xd3   :  { %1730 = vmatpush.bf16.msrb.mxu0 %v2969_v5  ;;  %v3710_v62 = vpop.f32.mrf.mxu0  ;;  %v3037_v5 = vor.u32 %v3424_v60, %v3034_v61  ;;  %v2842_v60 = vld [vmem:[#allocation5 + $0x518] sm:$0xf0]  ;;  %v1473_v61 = vadd.f32 %v3698_v33, %v310_v47  ;;  %v3445_v33 = vld [vmem:[#allocation8 + $0x30] sm:$0xff] }
  0xd5   :  { %1743 = vmatpush.bf16.msrb.mxu1 %v2205_v11  ;;  %1756 = vmatpush.bf16.msrb.mxu2 %v2333_v12  ;;  %v3712_v63 = vpop.f32.mrf.mxu1  ;;  %v3018_v11 = vld [vmem:[#allocation5 + $0x678] sm:$0xf0]  ;;  %v2637_v12 = vor.u32 %v3324_v1, %v2634_v2  ;;  %v1486_v8 = vadd.f32 %v3700_v35, %v1473_v61  ;;  %v3444_v35 = vld [vmem:[#allocation8 + $0x28] sm:$0xff] }
  0xd6   :  { %1769 = vmatpush.bf16.msrb.mxu3 %v2461_v16  ;;  %1731 = vmatmul.bf16.vlgmr.msrb.gmra.mxu0 %v3676_v37  ;;  %v2618_v16 = vld [vmem:[#allocation5 + $0x358] sm:$0xf0] }
  0xd7   :  { %1775 = vmatpush.bf16.msra.mxu0 %v2701_v17  ;;  %v3352_v17 = vld [vmem:[#allocation5 + $0x44c] sm:$0xf]  ;;  %v2621_v29 = vor.u32 %v3320_v15, %v2618_v16  ;;  %v3451_v16 = vld [vmem:[#allocation8 + $0x60] sm:$0xff] }
  0xd8   :  { %1757 = vmatmul.bf16.vlgmr.msrb.gmra.mxu2 %v3671_v21  ;;  %1744 = vmatmul.bf16.vlgmr.msrb.gmra.mxu1 %v3669_v20  ;;  %v2906_v21 = vld [vmem:[#allocation5 + $0x598] sm:$0xf0]  ;;  %v2781_v20 = vor.u32 %v3360_v56, %v2778_v58  ;;  %v3344_v56 = vld [vmem:[#allocation5 + $0x40c] sm:$0xf]  ;;  %v2989_v58 = vor.u32 %v3412_v48, %v2986_v50  ;;  %v3461_v50 = vld [vmem:[#allocation8 + $0xb0] sm:$0xff] }
  0xd9   :  { %1788 = vmatpush.bf16.msra.mxu1 %v2829_v19  ;;  %1801 = vmatpush.bf16.msra.mxu2 %v2957_v22  ;;  %v2909_v0 = vor.u32 %v3392_v59, %v2906_v21  ;;  %v3021_v19 = vor.u32 %v3420_v10, %v3018_v11  ;;  %v2746_v22 = vld [vmem:[#allocation5 + $0x458] sm:$0xf0]  ;;  %v3376_v21 = vld [vmem:[#allocation5 + $0x50c] sm:$0xf]  ;;  %v1499_v10 = vadd.f32 %v3702_v44, %v1486_v8  ;;  %v3453_v11 = vld [vmem:[#allocation8 + $0x70] sm:$0xff] }
  0xda   :  { %1814 = vmatpush.bf16.msra.mxu3 %v3085_v26  ;;  %v3002_v26 = vld [vmem:[#allocation5 + $0x658] sm:$0xf0]  ;;  %v2845_v3 = vor.u32 %v3376_v21, %v2842_v60  ;;  %v3459_v21 = vld [vmem:[#allocation8 + $0xa0] sm:$0xff] }
  0xdb   :  { %1770 = vmatmul.bf16.vlgmr.msrb.gmra.mxu3 %v3664_v4  ;;  %1776 = vmatpush.bf16.msra.mxu0 %v2685_v32  ;;  %v2653_v4 = vor.u32 %v3328_v54, %v2650_v55  ;;  %v3714_v18 = vpop.f32.mrf.mxu2  ;;  %v1526_v30 = vpop.f32.mrf.mxu0  ;;  %v2749_v32 = vor.u32 %v3352_v17, %v2746_v22  ;;  %v3005_v42 = vor.u32 %v3416_v25, %v3002_v26  ;;  %v3312_v54 = vld [vmem:[#allocation5 + $0x30c] sm:$0xf]  ;;  %v2586_v55 = vld [vmem:[#allocation5 + $0x318] sm:$0xf0]  ;;  %v3441_v22 = vld [vmem:[#allocation8 + $0x10] sm:$0xff] }
  0xdc   :  { %v2714_v59 = vld [vmem:[#allocation5 + $0x418] sm:$0xf0]  ;;  %v2589_v1 = vor.u32 %v3312_v54, %v2586_v55  ;;  %v3460_v55 = vld [vmem:[#allocation8 + $0xa8] sm:$0xff] }
  0xdd   :  { %1789 = vmatpush.bf16.msra.mxu1 %v2813_v34  ;;  %1802 = vmatpush.bf16.msra.mxu2 %v2941_v36  ;;  %v1539_v31 = vpop.f32.mrf.mxu1  ;;  %v2877_v34 = vor.u32 %v3384_v23, %v2874_v24  ;;  %v3316_v36 = vld [vmem:[#allocation5 + $0x32c] sm:$0xf]  ;;  %v2717_v2 = vor.u32 %v3344_v56, %v2714_v59  ;;  %v3458_v60 = vld [vmem:[#allocation8 + $0x98] sm:$0xff] }
  0xde   :  { %1815 = vmatpush.bf16.msra.mxu3 %v3069_v43  ;;  %v3716_v27 = vpop.f32.mrf.mxu3  ;;  %v2730_v43 = vld [vmem:[#allocation5 + $0x438] sm:$0xf0]  ;;  %v3448_v31 = vld [vmem:[#allocation8 + $0x48] sm:$0xff] }
  0xdf   :  { %1777 = vmatpush.bf16.msra.mxu0 %v2669_v51  ;;  %v2605_v51 = vor.u32 %v3316_v36, %v2602_v38  ;;  %v3439_v38 = vld [vmem:[#allocation8] sm:$0xff] }
  0xe1   :  { %1790 = vmatpush.bf16.msra.mxu1 %v2797_v52  ;;  %1803 = vmatpush.bf16.msra.mxu2 %v2925_v53  ;;  %v2733_v52 = vor.u32 %v3348_v39, %v2730_v43  ;;  %v2861_v53 = vor.u32 %v3380_v45, %v2858_v46 }
  0xe2   :  { %1816 = vmatpush.bf16.msra.mxu3 %v3053_v57 }
  0xe3   :  { %1778 = vmatpush.bf16.msra.mxu0 %v2653_v4  ;;  %v1552_v57 = vpop.f32.mrf.mxu2  ;;  %v3408_v4 = vld [vmem:[#allocation5 + $0x60c] sm:$0xf] }
  0xe5   :  { %1791 = vmatpush.bf16.msra.mxu1 %v2781_v20  ;;  %1804 = vmatpush.bf16.msra.mxu2 %v2909_v0  ;;  %v2970_v20 = vld [vmem:[#allocation5 + $0x618] sm:$0xf0] }
  0xe6   :  { %1817 = vmatpush.bf16.msra.mxu3 %v3037_v5  ;;  %v1565_v0 = vpop.f32.mrf.mxu3  ;;  %v2973_v5 = vor.u32 %v3408_v4, %v2970_v20  ;;  %v3457_v20 = vld [vmem:[#allocation8 + $0x90] sm:$0xff] }
  0xe7   :  { %1779 = vmatpush.bf16.msra.mxu0 %v2637_v12  ;;  %v1512_v12 = vadd.f32 %v3704_v49, %v1499_v10  ;;  %v311_v49 = vperm.slane %v3718_v28, 1  ;;  %v3456_v0 = vld [vmem:[#allocation8 + $0x88] sm:$0xff] }
  0xe9   :  { %1792 = vmatpush.bf16.msra.mxu1 %v2765_v13  ;;  %1805 = vmatpush.bf16.msra.mxu2 %v2893_v14  ;;  %v3452_v13 = vld [vmem:[#allocation8 + $0x68] sm:$0xff]  ;;  %v3443_v14 = vld [vmem:[#allocation8 + $0x20] sm:$0xff]  ;;  %v1525_v44 = vadd.f32 %v3710_v62, %v1512_v12  ;;  %v3449_v62 = vld [vmem:[#allocation8 + $0x50] sm:$0xff]  ;;  %v1564_v26 = vadd.f32 %v3716_v27, %v311_v49 }
  0xea   :  { %1818 = vmatpush.bf16.msra.mxu3 %v3021_v19  ;;  %v3469_v12 = vld [vmem:[#allocation8 + $0xf0] sm:$0xff] }
  0xeb   :  { %1780 = vmatpush.bf16.msra.mxu0 %v2621_v29  ;;  %v3440_v29 = vld [vmem:[#allocation8 + $0x8] sm:$0xff] }
  0xed   :  { %1793 = vmatpush.bf16.msra.mxu1 %v2749_v32  ;;  %1806 = vmatpush.bf16.msra.mxu2 %v2877_v34  ;;  %v3462_v32 = vld [vmem:[#allocation8 + $0xb8] sm:$0xff] }
  0xee   :  { %1819 = vmatpush.bf16.msra.mxu3 %v3005_v42 }
  0xef   :  { %1781 = vmatpush.bf16.msra.mxu0 %v2605_v51 }
  0xf1   :  { %1794 = vmatpush.bf16.msra.mxu1 %v2733_v52  ;;  %1807 = vmatpush.bf16.msra.mxu2 %v2861_v53 }
  0xf2   :  { %1820 = vmatpush.bf16.msra.mxu3 %v2989_v58 }
  0xf3   :  { %1782 = vmatpush.bf16.msra.mxu0 %v2589_v1  ;;  %v1576_v15 = vpop.f32.mrf.mxu0 }
  0xf4   :  { %v1577_v36 = vadd.f32 %v1576_v15, %v1564_v26  ;;  %v3468_v15 = vld [vmem:[#allocation8 + $0xe8] sm:$0xff] }
  0xf5   :  { %1795 = vmatpush.bf16.msra.mxu1 %v2717_v2  ;;  %1808 = vmatpush.bf16.msra.mxu2 %v2845_v3  ;;  %v3455_v3 = vld [vmem:[#allocation8 + $0x80] sm:$0xff] }
  0xf6   :  { %1821 = vmatpush.bf16.msra.mxu3 %v2973_v5  ;;  %1783 = vmatmul.bf16.vlgmr.msra.gmra.mxu0 %v3666_v6  ;;  %v1589_v6 = vpop.f32.mrf.mxu1  ;;  %v312_v5 = vperm.slane %v3718_v28, 2 }
  0xf7   :  { %2099 = vmatpush.bf16.msrb.mxu0 %v3446_v7  ;;  %v1590_v42 = vadd.f32 %v1589_v6, %v1577_v36  ;;  %v3467_v6 = vld [vmem:[#allocation8 + $0xe0] sm:$0xff]  ;;  %v313_v36 = vperm.slane %v3718_v28, 3 }
  0xf8   :  { %1796 = vmatmul.bf16.vlgmr.msra.gmra.mxu1 %v3678_v40  ;;  %1809 = vmatmul.bf16.vlgmr.msra.gmra.mxu2 %v3680_v41  ;;  %v3442_v40 = vld [vmem:[#allocation8 + $0x18] sm:$0xff]  ;;  %v1538_v41 = vadd.f32 %v3712_v63, %v1525_v44 }
  0xf9   :  { %2112 = vmatpush.bf16.msrb.mxu1 %v3454_v9  ;;  %1822 = vmatmul.bf16.vlgmr.msra.gmra.mxu3 %v3676_v37  ;;  %v3450_v37 = vld [vmem:[#allocation8 + $0x58] sm:$0xff] }
  0xfa   :  { %v1551_v24 = vadd.f32 %v3714_v18, %v1538_v41  ;;  %2125 = vmatpush.bf16.msrb.mxu2 %v3462_v32  ;;  %v3447_v18 = vld [vmem:[#allocation8 + $0x40] sm:$0xff]  ;;  %v3470_v9 = vld [vmem:[#allocation8 + $0xf8] sm:$0xff] }
  0xfb   :  { %2100 = vmatpush.bf16.msrb.mxu0 %v3445_v33  ;;  %v1602_v17 = vpop.f32.mrf.mxu2  ;;  %v1578_v23 = vpop.f32.mrf.mxu0  ;;  %2138 = vmatpush.bf16.msrb.mxu3 %v3470_v9 }
  0xfc   :  { %v1827_v30 = vmul.f32 0.1, %v1551_v24  ;;  %v1603_v27 = vadd.f32 %v1602_v17, %v1590_v42  ;;  %v3466_v17 = vld [vmem:[#allocation8 + $0xd8] sm:$0xff]  ;;  %v3465_v23 = vld [vmem:[#allocation8 + $0xd0] sm:$0xff] }
  0xfd   :  { %2113 = vmatpush.bf16.msrb.mxu1 %v3453_v11 }
  0xfe   :  { %v1615_v19 = vpop.f32.mrf.mxu3  ;;  %v1591_v25 = vpop.f32.mrf.mxu1  ;;  %v1831_v39 = vmax.f32 %v1551_v24, %v1827_v30  ;;  %2126 = vmatpush.bf16.msrb.mxu2 %v3461_v50 }
  0xff   :  { %2101 = vmatpush.bf16.msrb.mxu0 %v3444_v35  ;;  %v1616_v45 = vadd.f32 %v1615_v19, %v1603_v27  ;;  %2139 = vmatpush.bf16.msrb.mxu3 %v3469_v12 }
 0x100   :  { %v1835_v43 = vpack.c.bf16 %v1831_v39, %v1831_v39 }
 0x101   :  { %2114 = vmatpush.bf16.msrb.mxu1 %v3452_v13 }
 0x102   :  { %2127 = vmatpush.bf16.msrb.mxu2 %v3460_v55 }
 0x103   :  { %2102 = vmatpush.bf16.msrb.mxu0 %v3443_v14  ;;  %v1604_v63 = vpop.f32.mrf.mxu2  ;;  %2140 = vmatpush.bf16.msrb.mxu3 %v3468_v15 }
 0x105   :  { %2115 = vmatpush.bf16.msrb.mxu1 %v3451_v16 }
 0x106   :  { %v1617_v34 = vpop.f32.mrf.mxu3  ;;  %2128 = vmatpush.bf16.msrb.mxu2 %v3459_v21 }
 0x107   :  { %2103 = vmatpush.bf16.msrb.mxu0 %v3442_v40  ;;  %2141 = vmatpush.bf16.msrb.mxu3 %v3467_v6 }
 0x109   :  { %2116 = vmatpush.bf16.msrb.mxu1 %v3450_v37 }
 0x10a   :  { %2129 = vmatpush.bf16.msrb.mxu2 %v3458_v60 }
 0x10b   :  { %2104 = vmatpush.bf16.msrb.mxu0 %v3441_v22  ;;  %2142 = vmatpush.bf16.msrb.mxu3 %v3466_v17 }
 0x10d   :  { %2117 = vmatpush.bf16.msrb.mxu1 %v3449_v62 }
 0x10e   :  { %2130 = vmatpush.bf16.msrb.mxu2 %v3457_v20 }
 0x10f   :  { %2105 = vmatpush.bf16.msrb.mxu0 %v3440_v29  ;;  %2143 = vmatpush.bf16.msrb.mxu3 %v3465_v23  ;;  %v3464_v29 = vld [vmem:[#allocation8 + $0xc8] sm:$0xff] }
 0x111   :  { %2118 = vmatpush.bf16.msrb.mxu1 %v3448_v31  ;;  %v3463_v31 = vld [vmem:[#allocation8 + $0xc0] sm:$0xff] }
 0x112   :  { %2131 = vmatpush.bf16.msrb.mxu2 %v3456_v0 }
 0x113   :  { %2106 = vmatpush.bf16.msrb.mxu0 %v3439_v38  ;;  %v1628_v46 = vpop.f32.mrf.mxu0  ;;  %2144 = vmatpush.bf16.msrb.mxu3 %v3464_v29 }
 0x114   :  { %v1629_v47 = vadd.f32 %v1628_v46, %v1616_v45 }
 0x115   :  { %2119 = vmatpush.bf16.msrb.mxu1 %v3447_v18  ;;  %v1641_v48 = vpop.f32.mrf.mxu1 }
 0x116   :  { %2107 = vmatmul.bf16.vlgmr.msrb.gmra.mxu0 %v1835_v43  ;;  %v1642_v51 = vadd.f32 %v1641_v48, %v1629_v47  ;;  %2132 = vmatpush.bf16.msrb.mxu2 %v3455_v3 }
 0x117   :  { %2145 = vmatpush.bf16.msrb.mxu3 %v3463_v31 }
 0x118   :  { %v1828_v52 = vmul.f32 0.1, %v1642_v51 }
 0x11a   :  { %v1832_v53 = vmax.f32 %v1642_v51, %v1828_v52 }
 0x11b   :  { %v1654_v54 = vpop.f32.mrf.mxu2  ;;  %v1630_v57 = vpop.f32.mrf.mxu0 }
 0x11c   :  { %v1836_v58 = vpack.c.bf16 %v1832_v53, %v1832_v53  ;;  %v1655_v33 = vadd.f32 %v1654_v54, %v312_v5 }
 0x11d   :  { %v1643_v59 = vpop.f32.mrf.mxu1 }
 0x11e   :  { %v1667_v56 = vpop.f32.mrf.mxu3  ;;  %2120 = vmatmul.bf16.vlgmr.msrb.gmra.mxu1 %v1836_v58  ;;  %v3480_v59 = vld [vmem:[%s3746_s4] ss:$0 sm:$0xff]  ;;  %s3621_s4 = smov [#allocation10]  }
 0x11f   :  { %v1668_v35 = vadd.f32 %v1667_v56, %v1655_v33  ;;  %s2176_s15 = sshll.u32 %s3621_s4, 4  ;;  %s2177_s15 = int_to_ptr.vmem [resolvable:$true] %s2176_s15 }
 0x123   :  { %v1656_v61 = vpop.f32.mrf.mxu2 }
 0x126   :  { %v1669_v4 = vpop.f32.mrf.mxu3 }
 0x133   :  { %v1680_v1 = vpop.f32.mrf.mxu0 }
 0x134   :  { %v1681_v44 = vadd.f32 %v1680_v1, %v1668_v35 }
 0x135   :  { %v1693_v2 = vpop.f32.mrf.mxu1 }
 0x136   :  { %v1694_v16 = vadd.f32 %v1693_v2, %v1681_v44 }
 0x13b   :  { %v1706_v7 = vpop.f32.mrf.mxu2  ;;  %v1682_v10 = vpop.f32.mrf.mxu0 }
 0x13c   :  { %v1707_v40 = vadd.f32 %v1706_v7, %v1694_v16 }
 0x13d   :  { %v1695_v11 = vpop.f32.mrf.mxu1 }
 0x13e   :  { %v1719_v8 = vpop.f32.mrf.mxu3 }
 0x13f   :  { %v1720_v41 = vadd.f32 %v1719_v8, %v1707_v40 }
 0x143   :  { %v1708_v13 = vpop.f32.mrf.mxu2 }
 0x146   :  { %v1721_v14 = vpop.f32.mrf.mxu3 }
 0x153   :  { %v1732_v37 = vpop.f32.mrf.mxu0 }
 0x154   :  { %v1733_v19 = vadd.f32 %v1732_v37, %v1720_v41 }
 0x155   :  { %v1745_v49 = vpop.f32.mrf.mxu1 }
 0x156   :  { %v1829_v22 = vmul.f32 0.1, %v1733_v19  ;;  %v1746_v38 = vadd.f32 %v1745_v49, %v313_v36 }
 0x158   :  { %v1833_v24 = vmax.f32 %v1733_v19, %v1829_v22 }
 0x15a   :  { %v1837_v25 = vpack.c.bf16 %v1833_v24, %v1833_v24 }
 0x15b   :  { %v1758_v62 = vpop.f32.mrf.mxu2  ;;  %v1734_v30 = vpop.f32.mrf.mxu0 }
 0x15c   :  { %2133 = vmatmul.bf16.vlgmr.msrb.gmra.mxu2 %v1837_v25  ;;  %v1759_v39 = vadd.f32 %v1758_v62, %v1746_v38 }
 0x15d   :  { %v1747_v63 = vpop.f32.mrf.mxu1 }
 0x15e   :  { %v1771_v26 = vpop.f32.mrf.mxu3 }
 0x15f   :  { %v1772_v18 = vadd.f32 %v1771_v26, %v1759_v39 }
 0x163   :  { %v1760_v32 = vpop.f32.mrf.mxu2 }
 0x166   :  { %v1773_v34 = vpop.f32.mrf.mxu3 }
 0x173   :  { %v1784_v42 = vpop.f32.mrf.mxu0 }
 0x174   :  { %v1785_v27 = vadd.f32 %v1784_v42, %v1772_v18 }
 0x175   :  { %v1797_v43 = vpop.f32.mrf.mxu1 }
 0x176   :  { %v1798_v45 = vadd.f32 %v1797_v43, %v1785_v27 }
 0x17b   :  { %v1810_v46 = vpop.f32.mrf.mxu2  ;;  %v1786_v50 = vpop.f32.mrf.mxu0 }
 0x17c   :  { %v1811_v47 = vadd.f32 %v1810_v46, %v1798_v45  ;;  %v1823_v48 = vpop.f32.mrf.mxu3 }
 0x17d   :  { %v1799_v51 = vpop.f32.mrf.mxu1 }
 0x17e   :  { %v1824_v52 = vadd.f32 %v1823_v48, %v1811_v47 }
 0x180   :  { %v1830_v53 = vmul.f32 0.1, %v1824_v52 }
 0x182   :  { %v1834_v54 = vmax.f32 %v1824_v52, %v1830_v53 }
 0x183   :  { %v1812_v55 = vpop.f32.mrf.mxu2 }
 0x184   :  { %v1838_v56 = vpack.c.bf16 %v1834_v54, %v1834_v54  ;;  %v1825_v57 = vpop.f32.mrf.mxu3 }
 0x186   :  { %2146 = vmatmul.bf16.vlgmr.msrb.gmra.mxu3 %v1838_v56 }
 0x193   :  { %v2108_v28 = vpop.f32.mrf.mxu0 }
 0x194   :  { %v2109_v21 = vadd.f32 %v3480_v59, %v2108_v28 }
 0x19b   :  { %v2110_v58 = vpop.f32.mrf.mxu0  ;;  %v2121_v60 = vpop.f32.mrf.mxu1 }
 0x19c   :  { %v2122_v61 = vadd.f32 %v2121_v60, %v2109_v21 }
 0x1a3   :  { %v2123_v4 = vpop.f32.mrf.mxu1 }
 0x1df   :  { %v2134_v20 = vpop.f32.mrf.mxu2 }
 0x1e0   :  { %v2135_v1 = vadd.f32 %v2134_v20, %v2122_v61 }
 0x1e7   :  { %v2136_v0 = vpop.f32.mrf.mxu2 }
 0x209   :  { %v2147_v2 = vpop.f32.mrf.mxu3 }
 0x20a   :  { %v2148_v3 = vadd.f32 %v2147_v2, %v2135_v1 }
 0x20c   :  { %v3214_v5 = vmul.f32 -1.442695, %v2148_v3 }
 0x20e   :  { %3481 = vpow2.f32 %v3214_v5 }
 0x211   :  { %v2149_v7 = vpop.f32.mrf.mxu3 }
 0x214   :  { %v3482_v8 = vpop.eup %3481 }
 0x215   :  { %v2154_v9 = vadd.f32 1.0, %v3482_v8 }
 0x217   :  { %3483 = vrcp.f32 %v2154_v9  ;;  %v2166_v35 = vand.u32 2147483648, %v2154_v9  ;;  %v2164_v13 = vand.u32 2147483647, %v2154_v9  ;;  %vm2160_vm1 = vweird.f32 %v2154_v9 }
 0x219   :  { %v2167_v15 = vor.u32 1.1754944e-38, %v2166_v35  ;;  %vm2165_vm3 = vcmp.eq.f32.partialorder %v2164_v13, 8.507059e+37 }
 0x21d   :  { %v3484_v33 = vpop.eup %3483 }
 0x21e   :  { %v2156_v10 = vmul.f32 %v3484_v33, %v2154_v9  ;;  %vm2161_vm0 = vweird.f32 %v3484_v33 }
 0x21f   :  { %vm2162_vm2 = vmor %vm2160_vm1, %vm2161_vm0 }
 0x220   :  { %v2157_v11 = vsub.f32 1.0, %v2156_v10 }
 0x222   :  { %v2158_v12 = vmul.f32 %v3484_v33, %v2157_v11 }
 0x224   :  { %v2159_v14 = vadd.f32 %v3484_v33, %v2158_v12 }
 0x226   :  { %v2163_v44 = vsel %vm2162_vm2, %v3484_v33, %v2159_v14 }
 0x227   :  { %v2168_v6 = vsel %vm2165_vm3, %v2167_v15, %v2163_v44 }
 0x228   :  { %2170 = vst [vmem:[#allocation10] sm:$0xff] %v2168_v6 }
 0x229   :  { %2181 = dma.vmem_to_hbm [thread:$0]  %s2177_s15, 128, %s2179_s18, [#allocation4]  }
 0x22a   :  { %3611 = dma.done.wait [#allocation4], 128  }
 0x22b   :  { %3612 = vsyncadd [#allocation4], 4294967168 }
 0x22c   :  { %2186 = vsyncpa [#allocation3], 1 }
 0x22d   :  { %2187 = vsyncpa [#allocation6], 1 }
 0x22e   :  { %2188 = vsyncpa [#allocation9], 1 }
 0x22f   :  { %2189 = vsyncpa [#allocation4], 1 }

</bundles_post_ra>
